<compile_context>
chip_gen: v6e
topology: v6e:2x2x1
jax: 0.10.0
libtpu: 0.0.40
codegen_flags: <defaults>
</compile_context>

<pallas_src>
import functools

import numpy as np
import jax
import jax.numpy as jnp
from jax.experimental import pallas as pl
from jax.experimental.pallas import tpu as pltpu


# ----------------------------------------------------------------------------
# Fused kernel: encoder convs + mean/logvar + diffusion + MLP + partial MSE
# ----------------------------------------------------------------------------
def _lddpm_kernel(a1_ref, m0_ref, b0_ref, m1_ref, b1_ref, m2_ref, b2_ref,
                  wml_ref, bml_ref, w1_ref, bh1_ref, w2_ref, bo_ref,
                  eps_ref, noise_ref, coef_ref, temb_ref, lemb_ref,
                  sse_ref, act1_ref, act2_ref, *, heights, latent):
  f32 = jnp.float32
  bf16 = jnp.bfloat16
  h1, h2, h3 = heights[1], heights[2], heights[3]

  def conv_taps(read_tap, m_ref, b_ref, h_out):
    # 3x3 "same" conv lowered to 3 h-tap matmuls; f32 register accumulation,
    # bias + ReLU applied once (no scratch zero-init / RMW passes).
    acc = jnp.zeros((h_out, m_ref.shape[-1]), f32)
    for di in range(3):
      acc = acc + jnp.dot(read_tap(di), m_ref[di], preferred_element_type=f32)
    return jnp.maximum(acc + b_ref[...], 0.0)

  def store_with_halo(ref, x):
    # single aligned full-ref store: zero halo row + data rows
    ref[...] = jnp.concatenate(
        [jnp.zeros((1, x.shape[1]), x.dtype), x], axis=0)

  # ---- stage 0: stride 1. The input tile has zero halo rows above & below,
  # so every tap is one contiguous-row matmul over the whole tile.
  a1 = a1_ref[0]                                   # (H+2, 128) bf16
  x0 = conv_taps(lambda di: a1[di:di + h1, :], m0_ref, b0_ref, h1)
  store_with_halo(act1_ref, x0)

  # ---- stage 1: stride 2. Uniform strided tap reads from the halo'd scratch.
  x1 = conv_taps(lambda di: act1_ref[pl.ds(di, h2, 2), :].astype(bf16),
                 m1_ref, b1_ref, h2)
  store_with_halo(act2_ref, x1)

  # ---- stage 2: stride 2. Output stays register-resident (feeds the head).
  x2 = conv_taps(lambda di: act2_ref[pl.ds(di, h3, 2), :].astype(bf16),
                 m2_ref, b2_ref, h3)

  # ---- fused mean|logvar head on register-resident stage-2 rows -----------
  ml = bml_ref[...]                                # (1, 2*latent) f32
  x2b = x2.astype(bf16)
  for h in range(h3):
    ml = ml + jnp.dot(x2b[h:h + 1, :], wml_ref[h], preferred_element_type=f32)
  mean = ml[:, :latent]
  logvar = ml[:, latent:]

  # ---- reparameterize + forward diffusion (per-batch scalars from SMEM) ---
  b = pl.program_id(0)
  sab = coef_ref[b, 0]                             # sqrt(alpha_bar_t)
  s1ab = coef_ref[b, 1]                            # sqrt(1 - alpha_bar_t)
  noise = noise_ref[0]                             # (1, latent) f32
  sample = mean + jnp.exp(0.5 * logvar) * eps_ref[0]
  noisy = sab * sample + s1ab * noise

  # ---- conditional noise-estimation MLP: one lane-dense K=128 matmul ------
  cat = jnp.concatenate([noisy, temb_ref[0], lemb_ref[0]], axis=-1)  # (1,128)
  hid = jnp.maximum(
      jnp.dot(cat.astype(bf16), w1_ref[...], preferred_element_type=f32)
      + bh1_ref[...], 0.0)
  est = jnp.dot(hid.astype(bf16), w2_ref[...],
                preferred_element_type=f32) + bo_ref[...]

  # ---- per-batch partial SSE; final mean over (B*latent) finishes in XLA --
  diff = est - noise
  sse_ref[...] = jnp.sum(diff * diff, axis=-1, keepdims=True)[None]


# ----------------------------------------------------------------------------
# Host-side weight lowering (done once at init; parameter preprocessing only)
# ----------------------------------------------------------------------------
def _lower_conv(w_hwio, bias, w_in, stride):
  """Lower a 3x3 same-padding conv along W into per-h-tap matmul weights.

  w_hwio: (3, 3, Cin, Cout).  Returns M: (3, Win*Cin, Wout*Cout),
  lowered bias (1, Wout*Cout), Wout.
  TODO(synk): if loading pretrained PyTorch weights, permute from the
  (Cout, Cin, kh, kw) layout before calling this helper.
  """
  kh, kw, cin, cout = w_hwio.shape
  w_out = (w_in + 2 - kh) // stride + 1
  m = np.zeros((kh, w_in * cin, w_out * cout), np.float32)
  for di in range(kh):
    for wo in range(w_out):
      for dj in range(kw):
        wi = stride * wo + dj - 1
        if 0 <= wi < w_in:
          m[di, wi * cin:(wi + 1) * cin,
            wo * cout:(wo + 1) * cout] = w_hwio[di, dj]
  b_low = np.tile(np.asarray(bias, np.float32), w_out).reshape(1, w_out * cout)
  return m, b_low, w_out


def init_params(key, *, in_channels, H, W, mid_channels, latent_dim,
                num_classes, num_steps, temb_dim, lemb_dim, hidden_dim):
  # lane-dense MLP input: latent + t_emb + label_emb == 128
  assert latent_dim + temb_dim + lemb_dim == 128
  kit = iter(jax.random.split(key, 16))

  def nrm(shape, scale=0.05):
    return np.asarray(scale * jax.random.normal(next(kit), shape, jnp.float32))

  p = {}
  p["class_emb"] = jnp.asarray(nrm((num_classes, H * W)))

  c0p = 8                                   # stage-0 channels padded 5 -> 8
  strides = (1,) + (2,) * (len(mid_channels) - 1)
  cin = c0p
  w_cur = W
  for i, (cout, s) in enumerate(zip(mid_channels, strides)):
    w_hwio = nrm((3, 3, cin, cout))
    bias = nrm((cout,), 0.01)
    m, b_low, w_cur = _lower_conv(w_hwio, bias, w_cur, s)
    p[f"conv{i}_m"] = jnp.asarray(m, jnp.bfloat16)     # bf16 MXU operands
    p[f"conv{i}_b"] = jnp.asarray(b_low, jnp.float32)
    cin = cout

  down = 2 ** (len(mid_channels) - 1)
  h_last, w_last = H // down, W // down
  # fused mean|logvar head, per-h blocks matching the (h, w, c) flattening
  p["wml"] = jnp.asarray(
      nrm((h_last, w_last * mid_channels[-1], 2 * latent_dim)), jnp.bfloat16)
  p["bml"] = jnp.zeros((1, 2 * latent_dim), jnp.float32)

  # conditional noise-estimation network (the `network` module)
  p["t_emb"] = jnp.asarray(nrm((num_steps, temb_dim)))
  p["l_emb"] = jnp.asarray(nrm((num_classes, lemb_dim)))
  p["w1"] = jnp.asarray(nrm((latent_dim + temb_dim + lemb_dim, hidden_dim)),
                        jnp.bfloat16)
  p["bh1"] = jnp.zeros((1, hidden_dim), jnp.float32)
  p["w2"] = jnp.asarray(nrm((hidden_dim, latent_dim)), jnp.bfloat16)
  p["bo"] = jnp.zeros((1, latent_dim), jnp.float32)
  return p


# ----------------------------------------------------------------------------
# Forward pass: tiny XLA prologue (gathers / layout) + ONE pallas_call
# ----------------------------------------------------------------------------
def lddpm_forward(params, alpha_bars, x_nchw, label, rng_key, *,
                  num_steps, mid_channels, latent_dim):
  B, cin, H, W = x_nchw.shape
  strides = (1,) + (2,) * (len(mid_channels) - 1)
  heights = [H]
  widths = [W]
  for s in strides:
    heights.append((heights[-1] - 1) // s + 1)
    widths.append((widths[-1] - 1) // s + 1)

  c0p = 8
  assert cin + 1 <= c0p
  lane_widths = [widths[0] * c0p] + [widths[i + 1] * c
                                     for i, c in enumerate(mid_channels)]
  assert all(lw == 128 for lw in lane_widths), lane_widths  # lane-dense stages

  k_t, k_eps, k_noise = jax.random.split(rng_key, 3)
  # t = torch.randint(0, num_steps, [B])
  t = jax.random.randint(k_t, (B,), 0, num_steps)

  # NHWC image + class-embedding channel, zero-padded to 8 channels, flattened
  # to the kernel's (h, w*c) layout with zero h-halo rows (all free reshapes).
  x = jnp.transpose(x_nchw, (0, 2, 3, 1)).astype(jnp.float32)
  cmap = jnp.take(params["class_emb"], label, axis=0).reshape(B, H, W, 1)
  a1 = jnp.concatenate(
      [x, cmap, jnp.zeros((B, H, W, c0p - (cin + 1)), jnp.float32)], axis=-1)
  a1 = a1.reshape(B, H, W * c0p)
  a1 = jnp.pad(a1, ((0, 0), (1, 1), (0, 0))).astype(jnp.bfloat16)  # (B,H+2,128)

  # VarianceScheduler.add_noise coefficients -> SMEM scalar table
  ab_t = jnp.take(alpha_bars, t)
  coefs = jnp.stack([jnp.sqrt(ab_t), jnp.sqrt(1.0 - ab_t)],
                    axis=-1).astype(jnp.float32)                   # (B, 2)

  eps = jax.random.normal(k_eps, (B, 1, latent_dim), jnp.float32)
  noise = jax.random.normal(k_noise, (B, 1, latent_dim), jnp.float32)
  temb = jnp.take(params["t_emb"], t, axis=0)[:, None, :]
  lemb = jnp.take(params["l_emb"], label, axis=0)[:, None, :]

  kern = functools.partial(_lddpm_kernel, heights=tuple(heights),
                           latent=latent_dim)

  def resident(arr):          # full array, constant block index (weights)
    nd = arr.ndim
    return pl.BlockSpec(arr.shape, lambda i, _n=nd: (0,) * _n)

  def per_batch(arr):         # one batch element per grid step
    tail = arr.shape[1:]
    nz = len(tail)
    return pl.BlockSpec((1,) + tail, lambda i, _n=nz: (i,) + (0,) * _n)

  weights = (params["conv0_m"], params["conv0_b"],
             params["conv1_m"], params["conv1_b"],
             params["conv2_m"], params["conv2_b"],
             params["wml"], params["bml"],
             params["w1"], params["bh1"], params["w2"], params["bo"])

  in_specs = ([per_batch(a1)]
              + [resident(w) for w in weights]
              + [per_batch(eps), per_batch(noise),
                 pl.BlockSpec(memory_space=pltpu.MemorySpace.SMEM),
                 per_batch(temb), per_batch(lemb)])

  # Resident VMEM at these sizes: ~0.5 MiB weights + <32 KiB activations.
  sq = pl.pallas_call(
      kern,
      grid=(B,),
      out_shape=jax.ShapeDtypeStruct((B, 1, 1), jnp.float32),
      in_specs=in_specs,
      out_specs=pl.BlockSpec((1, 1, 1), lambda i: (i, 0, 0)),
      scratch_shapes=[pltpu.VMEM((heights[1] + 1, 128), jnp.float32),
                      pltpu.VMEM((heights[2] + 1, 128), jnp.float32)],
      compiler_params=pltpu.CompilerParams(
          dimension_semantics=("parallel",)),
  )(a1, *weights, eps, noise, coefs, temb, lemb)

  # loss = F.mse_loss(estimated_noise, noise): finish the mean reduction here
  return jnp.sum(sq) / (B * latent_dim)


if __name__ == "__main__":
  B, Cin, H, W = 2, 4, 16, 16
  mid_channels = (8, 16, 32)     # -> lane-dense 128-wide activations per stage
  latent_dim = 32
  num_classes = 10
  num_steps = 1000
  temb_dim, lemb_dim, hidden_dim = 32, 64, 64

  key = jax.random.PRNGKey(0)
  kp, kx, kl, kr = jax.random.split(key, 4)

  params = init_params(
      kp, in_channels=Cin, H=H, W=W, mid_channels=mid_channels,
      latent_dim=latent_dim, num_classes=num_classes, num_steps=num_steps,
      temb_dim=temb_dim, lemb_dim=lemb_dim, hidden_dim=hidden_dim)

  # VarianceScheduler (linear interpolation)
  betas = jnp.linspace(1e-4, 0.02, num_steps)
  alpha_bars = jnp.cumprod(1.0 - betas)

  x = jax.random.uniform(kx, (B, Cin, H, W), jnp.float32)   # NCHW input
  label = jax.random.randint(kl, (B,), 0, num_classes)

  fwd = jax.jit(functools.partial(
      lddpm_forward, num_steps=num_steps,
      mid_channels=mid_channels, latent_dim=latent_dim))

  loss = fwd(params, alpha_bars, x, label, kr)
  jax.block_until_ready(loss)
  assert loss.shape == () and bool(jnp.isfinite(loss))
  print("KERNEL_OK")
</pallas_src>

<mosaic_0001>
module attributes {stable_mosaic.version = 11 : i64} {
  func.func @_lddpm_kernel(%arg0: i32, %arg1: memref<1x18x128xbf16, #tpu.memory_space<vmem>>, %arg2: memref<3x128x128xbf16, #tpu.memory_space<vmem>>, %arg3: memref<1x128xf32, #tpu.memory_space<vmem>>, %arg4: memref<3x128x128xbf16, #tpu.memory_space<vmem>>, %arg5: memref<1x128xf32, #tpu.memory_space<vmem>>, %arg6: memref<3x128x128xbf16, #tpu.memory_space<vmem>>, %arg7: memref<1x128xf32, #tpu.memory_space<vmem>>, %arg8: memref<4x128x64xbf16, #tpu.memory_space<vmem>>, %arg9: memref<1x64xf32, #tpu.memory_space<vmem>>, %arg10: memref<128x64xbf16, #tpu.memory_space<vmem>>, %arg11: memref<1x64xf32, #tpu.memory_space<vmem>>, %arg12: memref<64x32xbf16, #tpu.memory_space<vmem>>, %arg13: memref<1x32xf32, #tpu.memory_space<vmem>>, %arg14: memref<1x1x32xf32, #tpu.memory_space<vmem>>, %arg15: memref<1x1x32xf32, #tpu.memory_space<vmem>>, %arg16: memref<2x2xf32, #tpu.memory_space<smem>>, %arg17: memref<1x1x32xf32, #tpu.memory_space<vmem>>, %arg18: memref<1x1x64xf32, #tpu.memory_space<vmem>>, %arg19: memref<1x1x1xf32, #tpu.memory_space<vmem>>, %arg20: memref<17x128xf32, #tpu.memory_space<vmem>>, %arg21: memref<9x128xf32, #tpu.memory_space<vmem>>) attributes {dimension_semantics = [#tpu.dimension_semantics<parallel>], iteration_bounds = array<i64: 2>, scalar_prefetch = 0 : i64, scratch_operands = 2 : i64, tpu.core_type = #tpu.core_type<tc>, window_params = [{transform_indices = @transform_0, window_bounds = array<i64: 1, 18, 128>}, {pipeline_mode = #tpu.pipeline_mode<synchronous>, transform_indices = @transform_1, window_bounds = array<i64: 3, 128, 128>}, {pipeline_mode = #tpu.pipeline_mode<synchronous>, transform_indices = @transform_2, window_bounds = array<i64: 1, 128>}, {pipeline_mode = #tpu.pipeline_mode<synchronous>, transform_indices = @transform_3, window_bounds = array<i64: 3, 128, 128>}, {pipeline_mode = #tpu.pipeline_mode<synchronous>, transform_indices = @transform_4, window_bounds = array<i64: 1, 128>}, {pipeline_mode = #tpu.pipeline_mode<synchronous>, transform_indices = @transform_5, window_bounds = array<i64: 3, 128, 128>}, {pipeline_mode = #tpu.pipeline_mode<synchronous>, transform_indices = @transform_6, window_bounds = array<i64: 1, 128>}, {pipeline_mode = #tpu.pipeline_mode<synchronous>, transform_indices = @transform_7, window_bounds = array<i64: 4, 128, 64>}, {pipeline_mode = #tpu.pipeline_mode<synchronous>, transform_indices = @transform_8, window_bounds = array<i64: 1, 64>}, {pipeline_mode = #tpu.pipeline_mode<synchronous>, transform_indices = @transform_9, window_bounds = array<i64: 128, 64>}, {pipeline_mode = #tpu.pipeline_mode<synchronous>, transform_indices = @transform_10, window_bounds = array<i64: 1, 64>}, {pipeline_mode = #tpu.pipeline_mode<synchronous>, transform_indices = @transform_11, window_bounds = array<i64: 64, 32>}, {pipeline_mode = #tpu.pipeline_mode<synchronous>, transform_indices = @transform_12, window_bounds = array<i64: 1, 32>}, {transform_indices = @transform_13, window_bounds = array<i64: 1, 1, 32>}, {transform_indices = @transform_14, window_bounds = array<i64: 1, 1, 32>}, {transform_indices = @transform_15, window_bounds = array<i64: 2, 2>}, {transform_indices = @transform_16, window_bounds = array<i64: 1, 1, 32>}, {transform_indices = @transform_17, window_bounds = array<i64: 1, 1, 64>}, {transform_indices = @transform_18, window_bounds = array<i64: 1, 1, 1>}]} {
    %c0 = arith.constant 0 : index
    %c0_0 = arith.constant 0 : index
    %c0_1 = arith.constant 0 : index
    %0 = vector.load %arg1[%c0, %c0_0, %c0_1] : memref<1x18x128xbf16, #tpu.memory_space<vmem>>, vector<1x18x128xbf16>
    %1 = vector.shape_cast %0 : vector<1x18x128xbf16> to vector<18x128xbf16>
    %cst = arith.constant 0.000000e+00 : f32
    %2 = vector.broadcast %cst : f32 to vector<16x128xf32>
    %3 = vector.extract_strided_slice %1 {offsets = [0, 0], sizes = [16, 128], strides = [1, 1]} : vector<18x128xbf16> to vector<16x128xbf16>
    %c0_2 = arith.constant 0 : index
    %c0_3 = arith.constant 0 : index
    %c0_4 = arith.constant 0 : index
    %4 = vector.load %arg2[%c0_2, %c0_3, %c0_4] : memref<3x128x128xbf16, #tpu.memory_space<vmem>>, vector<1x128x128xbf16>
    %5 = vector.shape_cast %4 : vector<1x128x128xbf16> to vector<128x128xbf16>
    %cst_5 = arith.constant dense<0.000000e+00> : vector<16x128xf32>
    %6 = tpu.matmul %3, %5, %cst_5 {dimension_numbers = #tpu.dot_dimension_numbers<[1], [0], [0], [1], [0, 0, 1, 1], [], []>} : vector<16x128xbf16>, vector<128x128xbf16>, vector<16x128xf32> -> vector<16x128xf32>
    %7 = arith.addf %2, %6 : vector<16x128xf32>
    %8 = vector.extract_strided_slice %1 {offsets = [1, 0], sizes = [16, 128], strides = [1, 1]} : vector<18x128xbf16> to vector<16x128xbf16>
    %c1 = arith.constant 1 : index
    %c0_6 = arith.constant 0 : index
    %c0_7 = arith.constant 0 : index
    %9 = vector.load %arg2[%c1, %c0_6, %c0_7] : memref<3x128x128xbf16, #tpu.memory_space<vmem>>, vector<1x128x128xbf16>
    %10 = vector.shape_cast %9 : vector<1x128x128xbf16> to vector<128x128xbf16>
    %cst_8 = arith.constant dense<0.000000e+00> : vector<16x128xf32>
    %11 = tpu.matmul %8, %10, %cst_8 {dimension_numbers = #tpu.dot_dimension_numbers<[1], [0], [0], [1], [0, 0, 1, 1], [], []>} : vector<16x128xbf16>, vector<128x128xbf16>, vector<16x128xf32> -> vector<16x128xf32>
    %12 = arith.addf %7, %11 : vector<16x128xf32>
    %13 = vector.extract_strided_slice %1 {offsets = [2, 0], sizes = [16, 128], strides = [1, 1]} : vector<18x128xbf16> to vector<16x128xbf16>
    %c2 = arith.constant 2 : index
    %c0_9 = arith.constant 0 : index
    %c0_10 = arith.constant 0 : index
    %14 = vector.load %arg2[%c2, %c0_9, %c0_10] : memref<3x128x128xbf16, #tpu.memory_space<vmem>>, vector<1x128x128xbf16>
    %15 = vector.shape_cast %14 : vector<1x128x128xbf16> to vector<128x128xbf16>
    %cst_11 = arith.constant dense<0.000000e+00> : vector<16x128xf32>
    %16 = tpu.matmul %13, %15, %cst_11 {dimension_numbers = #tpu.dot_dimension_numbers<[1], [0], [0], [1], [0, 0, 1, 1], [], []>} : vector<16x128xbf16>, vector<128x128xbf16>, vector<16x128xf32> -> vector<16x128xf32>
    %17 = arith.addf %12, %16 : vector<16x128xf32>
    %c0_12 = arith.constant 0 : index
    %c0_13 = arith.constant 0 : index
    %18 = vector.load %arg3[%c0_12, %c0_13] : memref<1x128xf32, #tpu.memory_space<vmem>>, vector<1x128xf32>
    %19 = vector.broadcast %18 : vector<1x128xf32> to vector<16x128xf32>
    %20 = arith.addf %17, %19 : vector<16x128xf32>
    %cst_14 = arith.constant 0.000000e+00 : f32
    %21 = vector.broadcast %cst_14 : f32 to vector<16x128xf32>
    %22 = arith.maximumf %20, %21 : vector<16x128xf32>
    %cst_15 = arith.constant 0.000000e+00 : f32
    %23 = vector.broadcast %cst_15 : f32 to vector<1x128xf32>
    %24 = tpu.concatenate %23, %22 in 0 : vector<1x128xf32>, vector<16x128xf32> -> vector<17x128xf32>
    %c0_16 = arith.constant 0 : index
    %c0_17 = arith.constant 0 : index
    %25 = vector.load %arg20[%c0_16, %c0_17] : memref<17x128xf32, #tpu.memory_space<vmem>>, vector<17x128xf32>
    tpu.vector_store %arg20[%c0_16, %c0_17], %24 {strides = array<i32>} : memref<17x128xf32, #tpu.memory_space<vmem>>, vector<17x128xf32>,
    %cst_18 = arith.constant 0.000000e+00 : f32
    %26 = vector.broadcast %cst_18 : f32 to vector<8x128xf32>
    %c0_19 = arith.constant 0 : index
    %c0_20 = arith.constant 0 : index
    %27 = tpu.strided_load %arg20[%c0_19, %c0_20] {strides = array<i32: 2, 1>} : memref<17x128xf32, #tpu.memory_space<vmem>>, vector<8x128xf32>
    %28 = arith.truncf %27 : vector<8x128xf32> to vector<8x128xbf16>
    %c0_21 = arith.constant 0 : index
    %c0_22 = arith.constant 0 : index
    %c0_23 = arith.constant 0 : index
    %29 = vector.load %arg4[%c0_21, %c0_22, %c0_23] : memref<3x128x128xbf16, #tpu.memory_space<vmem>>, vector<1x128x128xbf16>
    %30 = vector.shape_cast %29 : vector<1x128x128xbf16> to vector<128x128xbf16>
    %cst_24 = arith.constant dense<0.000000e+00> : vector<8x128xf32>
    %31 = tpu.matmul %28, %30, %cst_24 {dimension_numbers = #tpu.dot_dimension_numbers<[1], [0], [0], [1], [0, 0, 1, 1], [], []>} : vector<8x128xbf16>, vector<128x128xbf16>, vector<8x128xf32> -> vector<8x128xf32>
    %32 = arith.addf %26, %31 : vector<8x128xf32>
    %c1_25 = arith.constant 1 : index
    %c0_26 = arith.constant 0 : index
    %33 = tpu.strided_load %arg20[%c1_25, %c0_26] {strides = array<i32: 2, 1>} : memref<17x128xf32, #tpu.memory_space<vmem>>, vector<8x128xf32>
    %34 = arith.truncf %33 : vector<8x128xf32> to vector<8x128xbf16>
    %c1_27 = arith.constant 1 : index
    %c0_28 = arith.constant 0 : index
    %c0_29 = arith.constant 0 : index
    %35 = vector.load %arg4[%c1_27, %c0_28, %c0_29] : memref<3x128x128xbf16, #tpu.memory_space<vmem>>, vector<1x128x128xbf16>
    %36 = vector.shape_cast %35 : vector<1x128x128xbf16> to vector<128x128xbf16>
    %cst_30 = arith.constant dense<0.000000e+00> : vector<8x128xf32>
    %37 = tpu.matmul %34, %36, %cst_30 {dimension_numbers = #tpu.dot_dimension_numbers<[1], [0], [0], [1], [0, 0, 1, 1], [], []>} : vector<8x128xbf16>, vector<128x128xbf16>, vector<8x128xf32> -> vector<8x128xf32>
    %38 = arith.addf %32, %37 : vector<8x128xf32>
    %c2_31 = arith.constant 2 : index
    %c0_32 = arith.constant 0 : index
    %39 = tpu.strided_load %arg20[%c2_31, %c0_32] {strides = array<i32: 2, 1>} : memref<17x128xf32, #tpu.memory_space<vmem>>, vector<8x128xf32>
    %40 = arith.truncf %39 : vector<8x128xf32> to vector<8x128xbf16>
    %c2_33 = arith.constant 2 : index
    %c0_34 = arith.constant 0 : index
    %c0_35 = arith.constant 0 : index
    %41 = vector.load %arg4[%c2_33, %c0_34, %c0_35] : memref<3x128x128xbf16, #tpu.memory_space<vmem>>, vector<1x128x128xbf16>
    %42 = vector.shape_cast %41 : vector<1x128x128xbf16> to vector<128x128xbf16>
    %cst_36 = arith.constant dense<0.000000e+00> : vector<8x128xf32>
    %43 = tpu.matmul %40, %42, %cst_36 {dimension_numbers = #tpu.dot_dimension_numbers<[1], [0], [0], [1], [0, 0, 1, 1], [], []>} : vector<8x128xbf16>, vector<128x128xbf16>, vector<8x128xf32> -> vector<8x128xf32>
    %44 = arith.addf %38, %43 : vector<8x128xf32>
    %c0_37 = arith.constant 0 : index
    %c0_38 = arith.constant 0 : index
    %45 = vector.load %arg5[%c0_37, %c0_38] : memref<1x128xf32, #tpu.memory_space<vmem>>, vector<1x128xf32>
    %46 = vector.broadcast %45 : vector<1x128xf32> to vector<8x128xf32>
    %47 = arith.addf %44, %46 : vector<8x128xf32>
    %cst_39 = arith.constant 0.000000e+00 : f32
    %48 = vector.broadcast %cst_39 : f32 to vector<8x128xf32>
    %49 = arith.maximumf %47, %48 : vector<8x128xf32>
    %cst_40 = arith.constant 0.000000e+00 : f32
    %50 = vector.broadcast %cst_40 : f32 to vector<1x128xf32>
    %51 = tpu.concatenate %50, %49 in 0 : vector<1x128xf32>, vector<8x128xf32> -> vector<9x128xf32>
    %c0_41 = arith.constant 0 : index
    %c0_42 = arith.constant 0 : index
    %52 = vector.load %arg21[%c0_41, %c0_42] : memref<9x128xf32, #tpu.memory_space<vmem>>, vector<9x128xf32>
    tpu.vector_store %arg21[%c0_41, %c0_42], %51 {strides = array<i32>} : memref<9x128xf32, #tpu.memory_space<vmem>>, vector<9x128xf32>,
    %cst_43 = arith.constant 0.000000e+00 : f32
    %53 = vector.broadcast %cst_43 : f32 to vector<4x128xf32>
    %c0_44 = arith.constant 0 : index
    %c0_45 = arith.constant 0 : index
    %54 = tpu.strided_load %arg21[%c0_44, %c0_45] {strides = array<i32: 2, 1>} : memref<9x128xf32, #tpu.memory_space<vmem>>, vector<4x128xf32>
    %55 = arith.truncf %54 : vector<4x128xf32> to vector<4x128xbf16>
    %c0_46 = arith.constant 0 : index
    %c0_47 = arith.constant 0 : index
    %c0_48 = arith.constant 0 : index
    %56 = vector.load %arg6[%c0_46, %c0_47, %c0_48] : memref<3x128x128xbf16, #tpu.memory_space<vmem>>, vector<1x128x128xbf16>
    %57 = vector.shape_cast %56 : vector<1x128x128xbf16> to vector<128x128xbf16>
    %cst_49 = arith.constant dense<0.000000e+00> : vector<4x128xf32>
    %58 = tpu.matmul %55, %57, %cst_49 {dimension_numbers = #tpu.dot_dimension_numbers<[1], [0], [0], [1], [0, 0, 1, 1], [], []>} : vector<4x128xbf16>, vector<128x128xbf16>, vector<4x128xf32> -> vector<4x128xf32>
    %59 = arith.addf %53, %58 : vector<4x128xf32>
    %c1_50 = arith.constant 1 : index
    %c0_51 = arith.constant 0 : index
    %60 = tpu.strided_load %arg21[%c1_50, %c0_51] {strides = array<i32: 2, 1>} : memref<9x128xf32, #tpu.memory_space<vmem>>, vector<4x128xf32>
    %61 = arith.truncf %60 : vector<4x128xf32> to vector<4x128xbf16>
    %c1_52 = arith.constant 1 : index
    %c0_53 = arith.constant 0 : index
    %c0_54 = arith.constant 0 : index
    %62 = vector.load %arg6[%c1_52, %c0_53, %c0_54] : memref<3x128x128xbf16, #tpu.memory_space<vmem>>, vector<1x128x128xbf16>
    %63 = vector.shape_cast %62 : vector<1x128x128xbf16> to vector<128x128xbf16>
    %cst_55 = arith.constant dense<0.000000e+00> : vector<4x128xf32>
    %64 = tpu.matmul %61, %63, %cst_55 {dimension_numbers = #tpu.dot_dimension_numbers<[1], [0], [0], [1], [0, 0, 1, 1], [], []>} : vector<4x128xbf16>, vector<128x128xbf16>, vector<4x128xf32> -> vector<4x128xf32>
    %65 = arith.addf %59, %64 : vector<4x128xf32>
    %c2_56 = arith.constant 2 : index
    %c0_57 = arith.constant 0 : index
    %66 = tpu.strided_load %arg21[%c2_56, %c0_57] {strides = array<i32: 2, 1>} : memref<9x128xf32, #tpu.memory_space<vmem>>, vector<4x128xf32>
    %67 = arith.truncf %66 : vector<4x128xf32> to vector<4x128xbf16>
    %c2_58 = arith.constant 2 : index
    %c0_59 = arith.constant 0 : index
    %c0_60 = arith.constant 0 : index
    %68 = vector.load %arg6[%c2_58, %c0_59, %c0_60] : memref<3x128x128xbf16, #tpu.memory_space<vmem>>, vector<1x128x128xbf16>
    %69 = vector.shape_cast %68 : vector<1x128x128xbf16> to vector<128x128xbf16>
    %cst_61 = arith.constant dense<0.000000e+00> : vector<4x128xf32>
    %70 = tpu.matmul %67, %69, %cst_61 {dimension_numbers = #tpu.dot_dimension_numbers<[1], [0], [0], [1], [0, 0, 1, 1], [], []>} : vector<4x128xbf16>, vector<128x128xbf16>, vector<4x128xf32> -> vector<4x128xf32>
    %71 = arith.addf %65, %70 : vector<4x128xf32>
    %c0_62 = arith.constant 0 : index
    %c0_63 = arith.constant 0 : index
    %72 = vector.load %arg7[%c0_62, %c0_63] : memref<1x128xf32, #tpu.memory_space<vmem>>, vector<1x128xf32>
    %73 = vector.broadcast %72 : vector<1x128xf32> to vector<4x128xf32>
    %74 = arith.addf %71, %73 : vector<4x128xf32>
    %cst_64 = arith.constant 0.000000e+00 : f32
    %75 = vector.broadcast %cst_64 : f32 to vector<4x128xf32>
    %76 = arith.maximumf %74, %75 : vector<4x128xf32>
    %c0_65 = arith.constant 0 : index
    %c0_66 = arith.constant 0 : index
    %77 = vector.load %arg9[%c0_65, %c0_66] : memref<1x64xf32, #tpu.memory_space<vmem>>, vector<1x64xf32>
    %78 = arith.truncf %76 : vector<4x128xf32> to vector<4x128xbf16>
    %79 = vector.extract_strided_slice %78 {offsets = [0, 0], sizes = [1, 128], strides = [1, 1]} : vector<4x128xbf16> to vector<1x128xbf16>
    %c0_67 = arith.constant 0 : index
    %c0_68 = arith.constant 0 : index
    %c0_69 = arith.constant 0 : index
    %80 = vector.load %arg8[%c0_67, %c0_68, %c0_69] : memref<4x128x64xbf16, #tpu.memory_space<vmem>>, vector<1x128x64xbf16>
    %81 = vector.shape_cast %80 : vector<1x128x64xbf16> to vector<128x64xbf16>
    %cst_70 = arith.constant dense<0.000000e+00> : vector<1x64xf32>
    %82 = tpu.matmul %79, %81, %cst_70 {dimension_numbers = #tpu.dot_dimension_numbers<[1], [0], [0], [1], [0, 0, 1, 1], [], []>} : vector<1x128xbf16>, vector<128x64xbf16>, vector<1x64xf32> -> vector<1x64xf32>
    %83 = arith.addf %77, %82 : vector<1x64xf32>
    %84 = vector.extract_strided_slice %78 {offsets = [1, 0], sizes = [1, 128], strides = [1, 1]} : vector<4x128xbf16> to vector<1x128xbf16>
    %c1_71 = arith.constant 1 : index
    %c0_72 = arith.constant 0 : index
    %c0_73 = arith.constant 0 : index
    %85 = vector.load %arg8[%c1_71, %c0_72, %c0_73] : memref<4x128x64xbf16, #tpu.memory_space<vmem>>, vector<1x128x64xbf16>
    %86 = vector.shape_cast %85 : vector<1x128x64xbf16> to vector<128x64xbf16>
    %cst_74 = arith.constant dense<0.000000e+00> : vector<1x64xf32>
    %87 = tpu.matmul %84, %86, %cst_74 {dimension_numbers = #tpu.dot_dimension_numbers<[1], [0], [0], [1], [0, 0, 1, 1], [], []>} : vector<1x128xbf16>, vector<128x64xbf16>, vector<1x64xf32> -> vector<1x64xf32>
    %88 = arith.addf %83, %87 : vector<1x64xf32>
    %89 = vector.extract_strided_slice %78 {offsets = [2, 0], sizes = [1, 128], strides = [1, 1]} : vector<4x128xbf16> to vector<1x128xbf16>
    %c2_75 = arith.constant 2 : index
    %c0_76 = arith.constant 0 : index
    %c0_77 = arith.constant 0 : index
    %90 = vector.load %arg8[%c2_75, %c0_76, %c0_77] : memref<4x128x64xbf16, #tpu.memory_space<vmem>>, vector<1x128x64xbf16>
    %91 = vector.shape_cast %90 : vector<1x128x64xbf16> to vector<128x64xbf16>
    %cst_78 = arith.constant dense<0.000000e+00> : vector<1x64xf32>
    %92 = tpu.matmul %89, %91, %cst_78 {dimension_numbers = #tpu.dot_dimension_numbers<[1], [0], [0], [1], [0, 0, 1, 1], [], []>} : vector<1x128xbf16>, vector<128x64xbf16>, vector<1x64xf32> -> vector<1x64xf32>
    %93 = arith.addf %88, %92 : vector<1x64xf32>
    %94 = vector.extract_strided_slice %78 {offsets = [3, 0], sizes = [1, 128], strides = [1, 1]} : vector<4x128xbf16> to vector<1x128xbf16>
    %c3 = arith.constant 3 : index
    %c0_79 = arith.constant 0 : index
    %c0_80 = arith.constant 0 : index
    %95 = vector.load %arg8[%c3, %c0_79, %c0_80] : memref<4x128x64xbf16, #tpu.memory_space<vmem>>, vector<1x128x64xbf16>
    %96 = vector.shape_cast %95 : vector<1x128x64xbf16> to vector<128x64xbf16>
    %cst_81 = arith.constant dense<0.000000e+00> : vector<1x64xf32>
    %97 = tpu.matmul %94, %96, %cst_81 {dimension_numbers = #tpu.dot_dimension_numbers<[1], [0], [0], [1], [0, 0, 1, 1], [], []>} : vector<1x128xbf16>, vector<128x64xbf16>, vector<1x64xf32> -> vector<1x64xf32>
    %98 = arith.addf %93, %97 : vector<1x64xf32>
    %99 = vector.extract_strided_slice %98 {offsets = [0, 0], sizes = [1, 32], strides = [1, 1]} : vector<1x64xf32> to vector<1x32xf32>
    %100 = vector.extract_strided_slice %98 {offsets = [0, 32], sizes = [1, 32], strides = [1, 1]} : vector<1x64xf32> to vector<1x32xf32>
    %101 = arith.index_cast %arg0 : i32 to index
    %c0_82 = arith.constant 0 : index
    %102 = memref.load %arg16[%101, %c0_82] : memref<2x2xf32, #tpu.memory_space<smem>>
    %103 = arith.index_cast %arg0 : i32 to index
    %c1_83 = arith.constant 1 : index
    %104 = memref.load %arg16[%103, %c1_83] : memref<2x2xf32, #tpu.memory_space<smem>>
    %c0_84 = arith.constant 0 : index
    %c0_85 = arith.constant 0 : index
    %c0_86 = arith.constant 0 : index
    %105 = vector.load %arg15[%c0_84, %c0_85, %c0_86] : memref<1x1x32xf32, #tpu.memory_space<vmem>>, vector<1x1x32xf32>
    %106 = vector.shape_cast %105 : vector<1x1x32xf32> to vector<1x32xf32>
    %cst_87 = arith.constant 5.000000e-01 : f32
    %107 = vector.broadcast %cst_87 : f32 to vector<1x32xf32>
    %108 = arith.mulf %107, %100 : vector<1x32xf32>
    %109 = math.exp %108 : vector<1x32xf32>
    %c0_88 = arith.constant 0 : index
    %c0_89 = arith.constant 0 : index
    %c0_90 = arith.constant 0 : index
    %110 = vector.load %arg14[%c0_88, %c0_89, %c0_90] : memref<1x1x32xf32, #tpu.memory_space<vmem>>, vector<1x1x32xf32>
    %111 = vector.shape_cast %110 : vector<1x1x32xf32> to vector<1x32xf32>
    %112 = arith.mulf %109, %111 : vector<1x32xf32>
    %113 = arith.addf %99, %112 : vector<1x32xf32>
    %114 = vector.broadcast %102 : f32 to vector<1x32xf32>
    %115 = arith.mulf %114, %113 : vector<1x32xf32>
    %116 = vector.broadcast %104 : f32 to vector<1x32xf32>
    %117 = arith.mulf %116, %106 : vector<1x32xf32>
    %118 = arith.addf %115, %117 : vector<1x32xf32>
    %c0_91 = arith.constant 0 : index
    %c0_92 = arith.constant 0 : index
    %c0_93 = arith.constant 0 : index
    %119 = vector.load %arg17[%c0_91, %c0_92, %c0_93] : memref<1x1x32xf32, #tpu.memory_space<vmem>>, vector<1x1x32xf32>
    %120 = vector.shape_cast %119 : vector<1x1x32xf32> to vector<1x32xf32>
    %c0_94 = arith.constant 0 : index
    %c0_95 = arith.constant 0 : index
    %c0_96 = arith.constant 0 : index
    %121 = vector.load %arg18[%c0_94, %c0_95, %c0_96] : memref<1x1x64xf32, #tpu.memory_space<vmem>>, vector<1x1x64xf32>
    %122 = vector.shape_cast %121 : vector<1x1x64xf32> to vector<1x64xf32>
    %123 = tpu.concatenate %118, %120, %122 in 1 : vector<1x32xf32>, vector<1x32xf32>, vector<1x64xf32> -> vector<1x128xf32>
    %124 = arith.truncf %123 : vector<1x128xf32> to vector<1x128xbf16>
    %c0_97 = arith.constant 0 : index
    %c0_98 = arith.constant 0 : index
    %125 = vector.load %arg10[%c0_97, %c0_98] : memref<128x64xbf16, #tpu.memory_space<vmem>>, vector<128x64xbf16>
    %cst_99 = arith.constant dense<0.000000e+00> : vector<1x64xf32>
    %126 = tpu.matmul %124, %125, %cst_99 {dimension_numbers = #tpu.dot_dimension_numbers<[1], [0], [0], [1], [0, 0, 1, 1], [], []>} : vector<1x128xbf16>, vector<128x64xbf16>, vector<1x64xf32> -> vector<1x64xf32>
    %c0_100 = arith.constant 0 : index
    %c0_101 = arith.constant 0 : index
    %127 = vector.load %arg11[%c0_100, %c0_101] : memref<1x64xf32, #tpu.memory_space<vmem>>, vector<1x64xf32>
    %128 = arith.addf %126, %127 : vector<1x64xf32>
    %cst_102 = arith.constant 0.000000e+00 : f32
    %129 = vector.broadcast %cst_102 : f32 to vector<1x64xf32>
    %130 = arith.maximumf %128, %129 : vector<1x64xf32>
    %131 = arith.truncf %130 : vector<1x64xf32> to vector<1x64xbf16>
    %c0_103 = arith.constant 0 : index
    %c0_104 = arith.constant 0 : index
    %132 = vector.load %arg12[%c0_103, %c0_104] : memref<64x32xbf16, #tpu.memory_space<vmem>>, vector<64x32xbf16>
    %cst_105 = arith.constant dense<0.000000e+00> : vector<1x32xf32>
    %133 = tpu.matmul %131, %132, %cst_105 {dimension_numbers = #tpu.dot_dimension_numbers<[1], [0], [0], [1], [0, 0, 1, 1], [], []>} : vector<1x64xbf16>, vector<64x32xbf16>, vector<1x32xf32> -> vector<1x32xf32>
    %c0_106 = arith.constant 0 : index
    %c0_107 = arith.constant 0 : index
    %134 = vector.load %arg13[%c0_106, %c0_107] : memref<1x32xf32, #tpu.memory_space<vmem>>, vector<1x32xf32>
    %135 = arith.addf %133, %134 : vector<1x32xf32>
    %136 = arith.subf %135, %106 : vector<1x32xf32>
    %137 = arith.mulf %136, %136 : vector<1x32xf32>
    %cst_108 = arith.constant dense<0.000000e+00> : vector<1xf32>
    %138 = vector.multi_reduction <add>, %137, %cst_108 [1] : vector<1x32xf32> to vector<1xf32>
    %139 = vector.shape_cast %138 : vector<1xf32> to vector<1x1xf32>
    %140 = vector.shape_cast %139 : vector<1x1xf32> to vector<1x1x1xf32>
    %c0_109 = arith.constant 0 : index
    %c0_110 = arith.constant 0 : index
    %c0_111 = arith.constant 0 : index
    %141 = vector.load %arg19[%c0_109, %c0_110, %c0_111] : memref<1x1x1xf32, #tpu.memory_space<vmem>>, vector<1x1x1xf32>
    tpu.vector_store %arg19[%c0_109, %c0_110, %c0_111], %140 {strides = array<i32>} : memref<1x1x1xf32, #tpu.memory_space<vmem>>, vector<1x1x1xf32>,
    return
  }
  func.func @transform_0(%arg0: i32) -> (i32, i32, i32) {
    %c0_i32 = arith.constant 0 : i32
    %c0_i32_0 = arith.constant 0 : i32
    %c0_i32_1 = arith.constant 0 : i32
    return %arg0, %c0_i32, %c0_i32_0 : i32, i32, i32
  }
  func.func @transform_1(%arg0: i32) -> (i32, i32, i32) {
    %c0_i32 = arith.constant 0 : i32
    %c0_i32_0 = arith.constant 0 : i32
    %c0_i32_1 = arith.constant 0 : i32
    %c0_i32_2 = arith.constant 0 : i32
    return %c0_i32, %c0_i32_0, %c0_i32_1 : i32, i32, i32
  }
  func.func @transform_2(%arg0: i32) -> (i32, i32) {
    %c0_i32 = arith.constant 0 : i32
    %c0_i32_0 = arith.constant 0 : i32
    %c0_i32_1 = arith.constant 0 : i32
    return %c0_i32, %c0_i32_0 : i32, i32
  }
  func.func @transform_3(%arg0: i32) -> (i32, i32, i32) {
    %c0_i32 = arith.constant 0 : i32
    %c0_i32_0 = arith.constant 0 : i32
    %c0_i32_1 = arith.constant 0 : i32
    %c0_i32_2 = arith.constant 0 : i32
    return %c0_i32, %c0_i32_0, %c0_i32_1 : i32, i32, i32
  }
  func.func @transform_4(%arg0: i32) -> (i32, i32) {
    %c0_i32 = arith.constant 0 : i32
    %c0_i32_0 = arith.constant 0 : i32
    %c0_i32_1 = arith.constant 0 : i32
    return %c0_i32, %c0_i32_0 : i32, i32
  }
  func.func @transform_5(%arg0: i32) -> (i32, i32, i32) {
    %c0_i32 = arith.constant 0 : i32
    %c0_i32_0 = arith.constant 0 : i32
    %c0_i32_1 = arith.constant 0 : i32
    %c0_i32_2 = arith.constant 0 : i32
    return %c0_i32, %c0_i32_0, %c0_i32_1 : i32, i32, i32
  }
  func.func @transform_6(%arg0: i32) -> (i32, i32) {
    %c0_i32 = arith.constant 0 : i32
    %c0_i32_0 = arith.constant 0 : i32
    %c0_i32_1 = arith.constant 0 : i32
    return %c0_i32, %c0_i32_0 : i32, i32
  }
  func.func @transform_7(%arg0: i32) -> (i32, i32, i32) {
    %c0_i32 = arith.constant 0 : i32
    %c0_i32_0 = arith.constant 0 : i32
    %c0_i32_1 = arith.constant 0 : i32
    %c0_i32_2 = arith.constant 0 : i32
    return %c0_i32, %c0_i32_0, %c0_i32_1 : i32, i32, i32
  }
  func.func @transform_8(%arg0: i32) -> (i32, i32) {
    %c0_i32 = arith.constant 0 : i32
    %c0_i32_0 = arith.constant 0 : i32
    %c0_i32_1 = arith.constant 0 : i32
    return %c0_i32, %c0_i32_0 : i32, i32
  }
  func.func @transform_9(%arg0: i32) -> (i32, i32) {
    %c0_i32 = arith.constant 0 : i32
    %c0_i32_0 = arith.constant 0 : i32
    %c0_i32_1 = arith.constant 0 : i32
    return %c0_i32, %c0_i32_0 : i32, i32
  }
  func.func @transform_10(%arg0: i32) -> (i32, i32) {
    %c0_i32 = arith.constant 0 : i32
    %c0_i32_0 = arith.constant 0 : i32
    %c0_i32_1 = arith.constant 0 : i32
    return %c0_i32, %c0_i32_0 : i32, i32
  }
  func.func @transform_11(%arg0: i32) -> (i32, i32) {
    %c0_i32 = arith.constant 0 : i32
    %c0_i32_0 = arith.constant 0 : i32
    %c0_i32_1 = arith.constant 0 : i32
    return %c0_i32, %c0_i32_0 : i32, i32
  }
  func.func @transform_12(%arg0: i32) -> (i32, i32) {
    %c0_i32 = arith.constant 0 : i32
    %c0_i32_0 = arith.constant 0 : i32
    %c0_i32_1 = arith.constant 0 : i32
    return %c0_i32, %c0_i32_0 : i32, i32
  }
  func.func @transform_13(%arg0: i32) -> (i32, i32, i32) {
    %c0_i32 = arith.constant 0 : i32
    %c0_i32_0 = arith.constant 0 : i32
    %c0_i32_1 = arith.constant 0 : i32
    return %arg0, %c0_i32, %c0_i32_0 : i32, i32, i32
  }
  func.func @transform_14(%arg0: i32) -> (i32, i32, i32) {
    %c0_i32 = arith.constant 0 : i32
    %c0_i32_0 = arith.constant 0 : i32
    %c0_i32_1 = arith.constant 0 : i32
    return %arg0, %c0_i32, %c0_i32_0 : i32, i32, i32
  }
  func.func @transform_15(%arg0: i32) -> (i32, i32) {
    %c0_i32 = arith.constant 0 : i32
    %c0_i32_0 = arith.constant 0 : i32
    %c0_i32_1 = arith.constant 0 : i32
    return %c0_i32, %c0_i32_0 : i32, i32
  }
  func.func @transform_16(%arg0: i32) -> (i32, i32, i32) {
    %c0_i32 = arith.constant 0 : i32
    %c0_i32_0 = arith.constant 0 : i32
    %c0_i32_1 = arith.constant 0 : i32
    return %arg0, %c0_i32, %c0_i32_0 : i32, i32, i32
  }
  func.func @transform_17(%arg0: i32) -> (i32, i32, i32) {
    %c0_i32 = arith.constant 0 : i32
    %c0_i32_0 = arith.constant 0 : i32
    %c0_i32_1 = arith.constant 0 : i32
    return %arg0, %c0_i32, %c0_i32_0 : i32, i32, i32
  }
  func.func @transform_18(%arg0: i32) -> (i32, i32, i32) {
    %c0_i32 = arith.constant 0 : i32
    %c0_i32_0 = arith.constant 0 : i32
    %c0_i32_1 = arith.constant 0 : i32
    return %arg0, %c0_i32, %c0_i32_0 : i32, i32, i32
  }
}

</mosaic_0001>

<bundles_post_ra>
// kernel: lddpm_forward.3
= control target key start
LH: loop header
LB: loop body
LE: loop exit
PB: predicated region body
PF: predicated region fallthrough
CT: control target
= control target key end

     0   :  { %s4018_s0 = inlined_call_operand.vmem [shape: bf16[2,18,128], index: 0, kind: input, shape index: {}]   ;;  %s4019_s1 = inlined_call_operand.vmem [shape: bf16[3,128,128], index: 1, kind: input, shape index: {}]   ;;  %s4020_s2 = inlined_call_operand.vmem [shape: f32[1,128], index: 2, kind: input, shape index: {}]   ;;  %s4021_s3 = inlined_call_operand.vmem [shape: bf16[3,128,128], index: 3, kind: input, shape index: {}]   ;;  %s4022_s4 = inlined_call_operand.vmem [shape: f32[1,128], index: 4, kind: input, shape index: {}]   ;;  %s4023_s5 = inlined_call_operand.vmem [shape: bf16[3,128,128], index: 5, kind: input, shape index: {}]   ;;  %s4024_s6 = inlined_call_operand.vmem [shape: f32[1,128], index: 6, kind: input, shape index: {}]   ;;  %s4025_s7 = inlined_call_operand.vmem [shape: bf16[4,128,64], index: 7, kind: input, shape index: {}]   ;;  %s4026_s8 = inlined_call_operand.vmem [shape: f32[1,64], index: 8, kind: input, shape index: {}]   ;;  %s4027_s9 = inlined_call_operand.vmem [shape: bf16[128,64], index: 9, kind: input, shape index: {}]   ;;  %s4028_s10 = inlined_call_operand.vmem [shape: f32[1,64], index: 10, kind: input, shape index: {}]   ;;  %s4029_s11 = inlined_call_operand.vmem [shape: bf16[64,32], index: 11, kind: input, shape index: {}]   ;;  %s4030_s12 = inlined_call_operand.vmem [shape: f32[1,32], index: 12, kind: input, shape index: {}]   ;;  %s4031_s13 = inlined_call_operand.vmem [shape: f32[2,1,32], index: 13, kind: input, shape index: {}]   ;;  %s4032_s14 = inlined_call_operand.vmem [shape: f32[2,1,32], index: 14, kind: input, shape index: {}]   ;;  %s4033_s15 = inlined_call_operand.vmem [shape: f32[2,2], index: 15, kind: input, shape index: {}]   ;;  %s4034_s16 = inlined_call_operand.vmem [shape: f32[2,1,32], index: 16, kind: input, shape index: {}]   ;;  %s4035_s17 = inlined_call_operand.vmem [shape: f32[2,1,64], index: 17, kind: input, shape index: {}]   ;;  %s4036_s18 = inlined_call_operand.vmem [shape: f32[2,1,1], index: 18, kind: output, shape index: {}]  }
   0x1   :  { %4038 = sst [smem:[#allocation7_spill]] %s4018_s0 }
   0x2   :  { %4039 = sst [smem:[#allocation8_spill]] %s4019_s1 }
   0x3   :  { %4040 = sst [smem:[#allocation9_spill]] %s4020_s2 }
   0x4   :  { %23 = vsyncpa [#allocation5], 0  ;;  %s3429_s27 = smov 0  }
   0x5 LB: > { %s3435_s28 = sadd.s32 4294967295, %s3326_s27   ;;  %p2456_p0 = scmp.ge.s32.totalorder %s3326_s27, 1  ;;  %s3326_s27 = sphi %s3429_s27, %s29_s27  }
   0x6   : > { %p463_p1 = scmp.lt.s32.totalorder %s3326_s27, 3  ;;  %s512_s0 = sshll.u32 %s4033_s15, 4  ;;  %s513_s0 = int_to_ptr.vmem [resolvable:$true] %s512_s0 }
   0x7   : > { %p3165_p3 = scmp.eq.s32.totalorder %s3435_s28, 0  ;;  %s3301_s1 = scalar_lea.vmem %s513_s0, 32 }
   0x8   : > { %p3442_p2 = pnand %p2456_p0, %p463_p1  ;;  %p3302_p6 = scmp.ne.s32.totalorder %s513_s0, %s3301_s1 }
   0x9   : > { %p3309_p10 = scmp.lt.s32.totalorder %s513_s0, %s513_s0  ;;  %p3310_p11 = scmp.lt.s32.totalorder %s3301_s1, %s3301_s1 }
   0xa   : > { %p3161_p4 = pneg %p3442_p2 }
   0xb   : > { %p3311_p12 = por %p3310_p11, %p3309_p10 }
   0xc   : > { %p3162_p5 = pnand %p3165_p3, %p3161_p4 }
   0xe   : > { %p3303_p7 = pneg %p3162_p5 }
  0x10   : > { %p3304_p8 = pnand %p3303_p7, %p3302_p6 }
  0x12   : > { %p3305_p9 = pneg %p3304_p8 }
  0x14   : > { %p3312_p13 = pnand %p3311_p12, %p3305_p9 }
  0x16   : > { %3315 = shalt.err (!%p3312_p13)
}
  0x17   : > { %s3328_s20 = smov [#allocation4]   ;;  %557 = sbr.rel (%p3442_p2) target bundleno = 1706 (0x6aa), region = 92 }
  0x18   : > { %3164 = dma.vmem_to_smem (!%p3162_p5), %s513_s0, 32, %s3328_s20, [#allocation5]  }
  0x1c   : > { %3321 = dma.done.wait (%p3165_p3), [#allocation5], 32  }
  0x1d   : > { %3323 = vsyncadd (%p3165_p3), [#allocation5], 4294967264 }
  0x1e   : > { %563 = sfence }
  0x1f   : > { %s4042_s2 = sld [smem:[#allocation8_spill]]  ;;  %v3329_v1 = vmov 0.0   ;;  %vm3330_vm0 = vmmov 0   ;;  %p622_p0 = scmp.lt.s32.totalorder %s3435_s28, 1  ;;  %vm687_vm1 = vsmask.f32 7424 }
  0x20   : > { %2864 = vmatprep.subr.bf16.mxu0 %v3329_v1  ;;  %2884 = vmatprep.subr.bf16.mxu1 %v3329_v1  ;;  %s4043_s20 = sld [smem:[#allocation7_spill]]  ;;  %vm897_vm2 = vcmask 1046528   ;;  %v3207_v37 = vld [vmem:[%s4021_s3 + $0x78] sm:$0xff]   ;;  %v3209_v39 = vld [vmem:[%s4021_s3 + $0x70] sm:$0xff]   ;;  %v3211_v41 = vld [vmem:[%s4021_s3 + $0x68] sm:$0xff]   ;;  %vm1006_vm3 = vcmask 1040384  }
  0x21   : > { %2880 = vmatprep.mubr.msk.bf16.mxu0 %vm3330_vm0, %v3329_v1  ;;  %2900 = vmatprep.mubr.msk.bf16.mxu1 %vm3330_vm0, %v3329_v1  ;;  %s3482_s1 = scalar_select %p622_p0, %s3435_s28, 1  ;;  %v3208_v38 = vld [vmem:[%s4021_s3 + $0x38] sm:$0xff]   ;;  %v3210_v40 = vld [vmem:[%s4021_s3 + $0x30] sm:$0xff]   ;;  %v3212_v42 = vld [vmem:[%s4021_s3 + $0x28] sm:$0xff]   ;;  %vm2163_vm4 = vcmask 261120   ;;  %vm2165_vm5 = vcmask 523264  }
  0x22   : > { %v3213_v43 = vld [vmem:[%s4021_s3 + $0x60] sm:$0xff]   ;;  %v3215_v45 = vld [vmem:[%s4021_s3 + $0x58] sm:$0xff]   ;;  %v3217_v47 = vld [vmem:[%s4021_s3 + $0x50] sm:$0xff]   ;;  %s3331_s23 = smov 32   ;;  %s3332_s30 = smov 64   ;;  %vm2353_vm6 = vcmask 253952  }
  0x23   : > { %s3156_s24 = smul.u32 12, %s3482_s1  ;;  %v3214_v44 = vld [vmem:[%s4021_s3 + $0x20] sm:$0xff]   ;;  %v3216_v46 = vld [vmem:[%s4021_s3 + $0x18] sm:$0xff]   ;;  %v3218_v48 = vld [vmem:[%s4021_s3 + $0x10] sm:$0xff]   ;;  %s629_s22 = scalar_lea.vmem %s4031_s13, %s3482_s1  ;;  %vm2357_vm7 = vcmask 0  }
  0x24   : > { %v3219_v49 = vld [vmem:[%s4021_s3 + $0x48] sm:$0xff]   ;;  %v3221_v51 = vld [vmem:[%s4021_s3 + $0x40] sm:$0xff]   ;;  %s635_s19 = scalar_lea.vmem %s4034_s16, %s3482_s1  ;;  %s3333_s26 = smov 96  }
  0x25   : > { %v3181_v0 = vld [vmem:[%s4042_s2 + $0x78] sm:$0xff]   ;;  %v3183_v3 = vld [vmem:[%s4042_s2 + $0x70] sm:$0xff]   ;;  %v3185_v5 = vld [vmem:[%s4042_s2 + $0x68] sm:$0xff]  }
  0x26   : > { %v3182_v2 = vld [vmem:[%s4042_s2 + $0x38] sm:$0xff]   ;;  %2865 = vmatpush3.bf16.msra.mxu0 %v3181_v0  ;;  %v3184_v4 = vld [vmem:[%s4042_s2 + $0x30] sm:$0xff]   ;;  %v3186_v6 = vld [vmem:[%s4042_s2 + $0x28] sm:$0xff]   ;;  %s626_s21 = scalar_lea.vmem %s4043_s20, %s3156_s24  ;;  %s4044_s20 = sld [smem:[#allocation9_spill]] }
  0x27   : > { %2885 = vmatpush3.bf16.msra.mxu1 %v3182_v2  ;;  %2866 = vmatprep.subr.bf16.mxu0 %v3329_v1  ;;  %v3187_v7 = vld [vmem:[%s4042_s2 + $0x60] sm:$0xff]   ;;  %v3189_v9 = vld [vmem:[%s4042_s2 + $0x58] sm:$0xff]   ;;  %v3511_v12 = vld [vmem:[%s626_s21 + $0x8] ss:$0 sps:$4 sm:$0x11]   ;;  %s2715_s24 = sshll.u32 %s3435_s28, 7 }
  0x28   : > { %2886 = vmatprep.subr.bf16.mxu1 %v3329_v1  ;;  %v3188_v8 = vld [vmem:[%s4042_s2 + $0x20] sm:$0xff]   ;;  %v3190_v10 = vld [vmem:[%s4042_s2 + $0x18] sm:$0xff]   ;;  %v3191_v13 = vld [vmem:[%s4042_s2 + $0x50] sm:$0xff]   ;;  %v696_v19 = vshll.u32 %v3511_v12, 16  ;;  %v899_v26 = vrot.slane %v3511_v12, 1  ;;  %s2123_s29 = sadd.s32 1, %s2715_s24 }
  0x29   : > { %v3509_v11 = vld [vmem:[%s626_s21] sm:$0xff]   ;;  %v3192_v14 = vld [vmem:[%s4042_s2 + $0x10] sm:$0xff]   ;;  %v3193_v16 = vld [vmem:[%s4042_s2 + $0x48] sm:$0xff]   ;;  %s2122_s0 = sld [smem:[#allocation4 + %s2715_s24]] }
  0x2a   : > { %2867 = vmatpush3.bf16.msra.mxu0 %v3183_v3  ;;  %v691_v15 = vshll.u32 %v3509_v11, 16  ;;  %v689_v17 = vshrl.u32 %v3509_v11, 16  ;;  %v3194_v20 = vld [vmem:[%s4042_s2 + $0x8] sm:$0xff]   ;;  %v3195_v21 = vld [vmem:[%s4042_s2 + $0x40] sm:$0xff]   ;;  %v698_v23 = vrot.slane %v696_v19, 1  ;;  %v898_v25 = vrot.slane %v3509_v11, 1 }
  0x2b   : > { %2887 = vmatpush3.bf16.msra.mxu1 %v3184_v4  ;;  %2868 = vmatprep.subr.bf16.mxu0 %v3329_v1  ;;  %v3196_v22 = vld [vmem:[%s4042_s2] sm:$0xff]   ;;  %v3199_v27 = vld [vmem:[%s4042_s2 + $0xb8] sm:$0xff]   ;;  %v3200_v29 = vld [vmem:[%s4042_s2 + $0xb0] sm:$0xff]  }
  0x2c   : > { %2888 = vmatprep.subr.bf16.mxu1 %v3329_v1  ;;  %v693_v18 = vrot.slane %v691_v15, 1  ;;  %v3201_v30 = vld [vmem:[%s4042_s2 + $0xa8] sm:$0xff]   ;;  %v3202_v31 = vld [vmem:[%s4042_s2 + $0xa0] sm:$0xff]   ;;  %v3203_v32 = vld [vmem:[%s4042_s2 + $0x98] sm:$0xff]   ;;  %v900_v36 = vsel %vm897_vm2, %v898_v25, %v899_v26 }
  0x2d   : > { %v3204_v33 = vld [vmem:[%s4042_s2 + $0x90] sm:$0xff]   ;;  %v3205_v34 = vld [vmem:[%s4042_s2 + $0x88] sm:$0xff]   ;;  %v3206_v35 = vld [vmem:[%s4042_s2 + $0x80] sm:$0xff]  }
  0x2e   : > { %2869 = vmatpush3.bf16.msra.mxu0 %v3185_v5  ;;  %v694_v24 = vor.u32 %v693_v18, %v689_v17  ;;  %v3220_v50 = vld [vmem:[%s4021_s3 + $0x8] sm:$0xff]   ;;  %v3222_v52 = vld [vmem:[%s4021_s3] sm:$0xff]   ;;  %v3223_v17 = vld [vmem:[%s4021_s3 + $0xb8] sm:$0xff]  }
  0x2f   : > { %2889 = vmatpush3.bf16.msra.mxu1 %v3186_v6  ;;  %2870 = vmatprep.subr.bf16.mxu0 %v3329_v1  ;;  %v2520_v63 = vld [vmem:[%s4044_s20] ss:$0 sm:$0xff]  ;;  %v3229_v25 = vld [vmem:[%s4021_s3 + $0x88] sm:$0xff]  }
  0x30   : > { %2890 = vmatprep.subr.bf16.mxu1 %v3329_v1  ;;  %v699_v28 = vsel %vm687_vm1, %v694_v24, %v698_v23  ;;  %v3227_v23 = vld [vmem:[%s4021_s3 + $0x98] sm:$0xff]   ;;  %v3228_v24 = vld [vmem:[%s4021_s3 + $0x90] sm:$0xff]   ;;  %v3230_v26 = vld [vmem:[%s4021_s3 + $0x80] sm:$0xff]  }
  0x32   : > { %2871 = vmatpush3.bf16.msra.mxu0 %v3187_v7 }
  0x33   : > { %2891 = vmatpush3.bf16.msra.mxu1 %v3188_v8  ;;  %2872 = vmatprep.subr.bf16.mxu0 %v3329_v1 }
  0x34   : > { %2892 = vmatprep.subr.bf16.mxu1 %v3329_v1 }
  0x36   : > { %2873 = vmatpush3.bf16.msra.mxu0 %v3189_v9 }
  0x37   : > { %2893 = vmatpush3.bf16.msra.mxu1 %v3190_v10  ;;  %2874 = vmatprep.subr.bf16.mxu0 %v3329_v1 }
  0x38   : > { %2894 = vmatprep.subr.bf16.mxu1 %v3329_v1 }
  0x3a   : > { %2875 = vmatpush3.bf16.msra.mxu0 %v3191_v13 }
  0x3b   : > { %2895 = vmatpush3.bf16.msra.mxu1 %v3192_v14  ;;  %2876 = vmatprep.subr.bf16.mxu0 %v3329_v1 }
  0x3c   : > { %2896 = vmatprep.subr.bf16.mxu1 %v3329_v1 }
  0x3e   : > { %2877 = vmatpush3.bf16.msra.mxu0 %v3193_v16 }
  0x3f   : > { %2897 = vmatpush3.bf16.msra.mxu1 %v3194_v20  ;;  %2878 = vmatprep.subr.bf16.mxu0 %v3329_v1  ;;  %v3224_v20 = vld [vmem:[%s4021_s3 + $0xb0] sm:$0xff]  }
  0x40   : > { %2898 = vmatprep.subr.bf16.mxu1 %v3329_v1 }
  0x42   : > { %2879 = vmatpush3.bf16.msra.mxu0 %v3195_v21  ;;  %v3225_v21 = vld [vmem:[%s4021_s3 + $0xa8] sm:$0xff]  }
  0x43   : > { %2899 = vmatpush3.bf16.msra.mxu1 %v3196_v22  ;;  %2904 = vmatprep.subr.bf16.mxu0 %v3329_v1  ;;  %v3226_v22 = vld [vmem:[%s4021_s3 + $0xa0] sm:$0xff]  }
  0x44   : > { %2924 = vmatprep.subr.bf16.mxu1 %v3329_v1 }
  0x45   : > { %2881 = vmatmul.mubr.bf16.vlgmr.msra.gmra.mxu0 %v699_v28 }
  0x46   : > { %2901 = vmatmul.mubr.bf16.vlgmr.msra.gmra.mxu1 %v3509_v11  ;;  %2905 = vmatpush3.bf16.msra.mxu0 %v3199_v27 }
  0x47   : > { %2906 = vmatprep.subr.bf16.mxu0 %v3329_v1  ;;  %2920 = vmatprep.mubr.msk.bf16.mxu0 %vm3330_vm0, %v3329_v1 }
  0x48   : > { %2940 = vmatprep.mubr.msk.bf16.mxu1 %vm3330_vm0, %v3329_v1  ;;  %2925 = vmatpush3.bf16.msra.mxu1 %v3207_v37  ;;  %v3239_v37 = vld [vmem:[%s4023_s5 + $0x58] sm:$0xff]  }
  0x49   : > { %2926 = vmatprep.subr.bf16.mxu1 %v3329_v1 }
  0x4a   : > { %2907 = vmatpush3.bf16.msra.mxu0 %v3200_v29  ;;  %v3231_v29 = vld [vmem:[%s4023_s5 + $0x78] sm:$0xff]  }
  0x4b   : > { %2908 = vmatprep.subr.bf16.mxu0 %v3329_v1 }
  0x4c   : > { %2927 = vmatpush3.bf16.msra.mxu1 %v3209_v39  ;;  %v3241_v39 = vld [vmem:[%s4023_s5 + $0x50] sm:$0xff]  }
  0x4d   : > { %2928 = vmatprep.subr.bf16.mxu1 %v3329_v1 }
  0x4e   : > { %2909 = vmatpush3.bf16.msra.mxu0 %v3201_v30  ;;  %v3232_v30 = vld [vmem:[%s4023_s5 + $0x38] sm:$0xff]  }
  0x4f   : > { %2910 = vmatprep.subr.bf16.mxu0 %v3329_v1 }
  0x50   : > { %2929 = vmatpush3.bf16.msra.mxu1 %v3211_v41  ;;  %v3243_v41 = vld [vmem:[%s4023_s5 + $0x48] sm:$0xff]  }
  0x51   : > { %2930 = vmatprep.subr.bf16.mxu1 %v3329_v1 }
  0x52   : > { %2911 = vmatpush3.bf16.msra.mxu0 %v3202_v31  ;;  %v3233_v31 = vld [vmem:[%s4023_s5 + $0x70] sm:$0xff]  }
  0x53   : > { %2912 = vmatprep.subr.bf16.mxu0 %v3329_v1 }
  0x54   : > { %2931 = vmatpush3.bf16.msra.mxu1 %v3213_v43  ;;  %v3245_v43 = vld [vmem:[%s4023_s5 + $0x40] sm:$0xff]  }
  0x55   : > { %2932 = vmatprep.subr.bf16.mxu1 %v3329_v1 }
  0x56   : > { %2913 = vmatpush3.bf16.msra.mxu0 %v3203_v32  ;;  %v3234_v32 = vld [vmem:[%s4023_s5 + $0x30] sm:$0xff]  }
  0x57   : > { %2914 = vmatprep.subr.bf16.mxu0 %v3329_v1 }
  0x58   : > { %2933 = vmatpush3.bf16.msra.mxu1 %v3215_v45 }
  0x59   : > { %2934 = vmatprep.subr.bf16.mxu1 %v3329_v1 }
  0x5a   : > { %2915 = vmatpush3.bf16.msra.mxu0 %v3204_v33  ;;  %v3235_v33 = vld [vmem:[%s4023_s5 + $0x68] sm:$0xff]  }
  0x5b   : > { %2916 = vmatprep.subr.bf16.mxu0 %v3329_v1 }
  0x5c   : > { %2935 = vmatpush3.bf16.msra.mxu1 %v3217_v47 }
  0x5d   : > { %2936 = vmatprep.subr.bf16.mxu1 %v3329_v1 }
  0x5e   : > { %2917 = vmatpush3.bf16.msra.mxu0 %v3205_v34  ;;  %v3236_v34 = vld [vmem:[%s4023_s5 + $0x28] sm:$0xff]  }
  0x5f   : > { %2918 = vmatprep.subr.bf16.mxu0 %v3329_v1 }
  0x60   : > { %2937 = vmatpush3.bf16.msra.mxu1 %v3219_v49 }
  0x61   : > { %2938 = vmatprep.subr.bf16.mxu1 %v3329_v1 }
  0x62   : > { %2919 = vmatpush3.bf16.msra.mxu0 %v3206_v35  ;;  %v3237_v35 = vld [vmem:[%s4023_s5 + $0x60] sm:$0xff]  }
  0x63   : > { %2944 = vmatprep.subr.bf16.mxu0 %v3329_v1 }
  0x64   : > { %2939 = vmatpush3.bf16.msra.mxu1 %v3221_v51 }
  0x65   : > { %2921 = vmatmul.mubr.bf16.vlgmr.msra.gmra.mxu0 %v900_v36  ;;  %2964 = vmatprep.subr.bf16.mxu1 %v3329_v1  ;;  %v3238_v36 = vld [vmem:[%s4023_s5 + $0x20] sm:$0xff]  }
  0x66   : > { %2960 = vmatprep.mubr.msk.bf16.mxu0 %vm3330_vm0, %v3329_v1  ;;  %2945 = vmatpush3.bf16.msra.mxu0 %v3208_v38  ;;  %v3240_v38 = vld [vmem:[%s4023_s5 + $0x18] sm:$0xff]  }
  0x67   : > { %2946 = vmatprep.subr.bf16.mxu0 %v3329_v1 }
  0x6a   : > { %2947 = vmatpush3.bf16.msra.mxu0 %v3210_v40  ;;  %v3242_v40 = vld [vmem:[%s4023_s5 + $0x10] sm:$0xff]  }
  0x6b   : > { %2948 = vmatprep.subr.bf16.mxu0 %v3329_v1 }
  0x6e   : > { %2949 = vmatpush3.bf16.msra.mxu0 %v3212_v42  ;;  %v3244_v42 = vld [vmem:[%s4023_s5 + $0x8] sm:$0xff]  }
  0x6f   : > { %2950 = vmatprep.subr.bf16.mxu0 %v3329_v1 }
  0x72   : > { %2951 = vmatpush3.bf16.msra.mxu0 %v3214_v44  ;;  %v3246_v44 = vld [vmem:[%s4023_s5] sm:$0xff]  }
  0x73   : > { %2952 = vmatprep.subr.bf16.mxu0 %v3329_v1 }
  0x76   : > { %2953 = vmatpush3.bf16.msra.mxu0 %v3216_v46 }
  0x77   : > { %2954 = vmatprep.subr.bf16.mxu0 %v3329_v1 }
  0x7a   : > { %2955 = vmatpush3.bf16.msra.mxu0 %v3218_v48 }
  0x7b   : > { %2956 = vmatprep.subr.bf16.mxu0 %v3329_v1 }
  0x7e   : > { %2957 = vmatpush3.bf16.msra.mxu0 %v3220_v50 }
  0x7f   : > { %2958 = vmatprep.subr.bf16.mxu0 %v3329_v1 }
  0x82   : > { %2959 = vmatpush3.bf16.msra.mxu0 %v3222_v52 }
  0x83   : > { %2984 = vmatprep.subr.bf16.mxu0 %v3329_v1 }
 0x105   : > { %v783_v53 = vpop.f32.mrf.mxu0 }
 0x106   : > { %v873_v54 = vpop.f32.mrf.mxu1 }
 0x107   : > { %v2882_v55 = vpop.f32.mrf.mxu0  ;;  %v874_v61 = vadd.f32 %v873_v54, %v783_v53 }
 0x108   : > { %v2902_v56 = vpop.f32.mrf.mxu1  ;;  %v2577_v55 = vld [vmem:[%s4022_s4] ss:$0 sm:$0xff] }
 0x109   : > { %v786_v57 = vpop.f32.mrf.mxu0 }
 0x10a   : > { %v876_v58 = vpop.f32.mrf.mxu1 }
 0x10b   : > { %v2883_v59 = vpop.f32.mrf.mxu0  ;;  %v877_v3 = vadd.f32 %v876_v58, %v786_v57 }
 0x10c   : > { %v2903_v60 = vpop.f32.mrf.mxu1 }
 0x125   : > { %v984_v62 = vpop.f32.mrf.mxu0 }
 0x126   : > { %v991_v0 = vadd.f32 %v984_v62, %v874_v61 }
 0x127   : > { %v2922_v2 = vpop.f32.mrf.mxu0 }
 0x128   : > { %v1000_v4 = vadd.f32 %v2520_v63, %v991_v0  ;;  %v3247_v0 = vld [vmem:[%s4023_s5 + $0xb8] sm:$0xff]  }
 0x129   : > { %v987_v5 = vpop.f32.mrf.mxu0 }
 0x12a   : > { %v1002_v6 = vmax.f32 %v1000_v4, 0.0  ;;  %v992_v7 = vadd.f32 %v987_v5, %v877_v3 }
 0x12b   : > { %v2923_v8 = vpop.f32.mrf.mxu0 }
 0x12c   : > { %v1007_v9 = vrot.slane %v1002_v6, 7  ;;  %v1001_v10 = vadd.f32 %v2520_v63, %v992_v7  ;;  %v3248_v6 = vld [vmem:[%s4023_s5 + $0xb0] sm:$0xff]   ;;  %v3249_v7 = vld [vmem:[%s4023_s5 + $0xa8] sm:$0xff]   ;;  %v3250_v8 = vld [vmem:[%s4023_s5 + $0xa0] sm:$0xff]  }
 0x12e   : > { %v1013_v11 = vsel %vm1006_vm3, 0.0, %v1007_v9  ;;  %v1003_v12 = vmax.f32 %v1001_v10, 0.0  ;;  %v3252_v10 = vld [vmem:[%s4023_s5 + $0x90] sm:$0xff]  }
 0x12f   : > { %1014 = vst [vmem:[#allocation2] sm:$0xff] %v1013_v11  ;;  %v3253_v11 = vld [vmem:[%s4023_s5 + $0x88] sm:$0xff]  }
 0x130   : > { %v1008_v13 = vrot.slane %v1003_v12, 7  ;;  %v3254_v12 = vld [vmem:[%s4023_s5 + $0x80] sm:$0xff]  }
 0x132   : > { %v1009_v14 = vsel %vm1006_vm3, %v1007_v9, %v1008_v13  ;;  %1016 = vst [vmem:[#allocation2 + $0x10] sm:$0x1] %v1008_v13  ;;  %v3251_v9 = vld [vmem:[%s4023_s5 + $0x98] sm:$0xff]  }
 0x133   : > { %1015 = vst [vmem:[#allocation2 + $0x8] sm:$0xff] %v1009_v14 }
 0x13a   : > { %v1036_v15 = vld [vmem:[#allocation2 + $0x1] ss:$2 sm:$0xff]  ;;  %v1017_v16 = vld [vmem:[#allocation2] ss:$2 sm:$0xff] }
 0x13b   : > { %v1037_v18 = vpack.c.bf16 %v1036_v15, %v1036_v15  ;;  %v1018_v19 = vpack.c.bf16 %v1017_v16, %v1017_v16  ;;  %v1232_v27 = vld [vmem:[#allocation2 + $0x2] ss:$2 sm:$0xff]  ;;  %v3255_v15 = vld [vmem:[%s4025_s7 + $0x38] sm:$0xff]  }
 0x13c   : > { %v1233_v28 = vpack.c.bf16 %v1232_v27, %v1232_v27  ;;  %v3256_v16 = vld [vmem:[%s4025_s7 + $0x78] sm:$0xff]   ;;  %v3267_v27 = vld [vmem:[%s4025_s7 + $0x8] sm:$0xff]  }
 0x13d   : > { %2941 = vmatmul.mubr.bf16.vlgmr.msra.gmra.mxu1 %v1037_v18  ;;  %2961 = vmatmul.mubr.bf16.vlgmr.msra.gmra.mxu0 %v1018_v19  ;;  %v3258_v18 = vld [vmem:[%s4025_s7 + $0x70] sm:$0xff]   ;;  %v3259_v19 = vld [vmem:[%s4025_s7 + $0x28] sm:$0xff]  }
 0x13e   : > { %2965 = vmatpush3.bf16.msra.mxu1 %v3223_v17  ;;  %2980 = vmatprep.mubr.msk.bf16.mxu1 %vm3330_vm0, %v3329_v1  ;;  %v3257_v17 = vld [vmem:[%s4025_s7 + $0x30] sm:$0xff]  }
 0x13f   : > { %2966 = vmatprep.subr.bf16.mxu1 %v3329_v1  ;;  %3000 = vmatprep.mubr.msk.bf16.mxu0 %vm3330_vm0, %v3329_v1 }
 0x140   : > { %2985 = vmatpush3.bf16.msra.mxu0 %v3231_v29  ;;  %v3269_v29 = vld [vmem:[%s4025_s7] sm:$0xff]  }
 0x141   : > { %2986 = vmatprep.subr.bf16.mxu0 %v3329_v1 }
 0x142   : > { %2967 = vmatpush3.bf16.msra.mxu1 %v3224_v20  ;;  %v3260_v20 = vld [vmem:[%s4025_s7 + $0x68] sm:$0xff]  }
 0x143   : > { %2968 = vmatprep.subr.bf16.mxu1 %v3329_v1 }
 0x144   : > { %2987 = vmatpush3.bf16.msra.mxu0 %v3233_v31  ;;  %v2129_v31 = vld [vmem:[%s629_s22] sm:$0x1]  ;;  %s638_s22 = scalar_lea.vmem %s4035_s17, %s3482_s1 }
 0x145   : > { %2988 = vmatprep.subr.bf16.mxu0 %v3329_v1  ;;  %2131 = vrot.lane.b32.xlu0 %v2129_v31, %s3331_s23 }
 0x146   : > { %2969 = vmatpush3.bf16.msra.mxu1 %v3225_v21  ;;  %v3261_v21 = vld [vmem:[%s4025_s7 + $0x20] sm:$0xff]  }
 0x147   : > { %2970 = vmatprep.subr.bf16.mxu1 %v3329_v1 }
 0x148   : > { %2989 = vmatpush3.bf16.msra.mxu0 %v3235_v33 }
 0x149   : > { %2990 = vmatprep.subr.bf16.mxu0 %v3329_v1 }
 0x14a   : > { %2971 = vmatpush3.bf16.msra.mxu1 %v3226_v22  ;;  %v3262_v22 = vld [vmem:[%s4025_s7 + $0x60] sm:$0xff]  }
 0x14b   : > { %2972 = vmatprep.subr.bf16.mxu1 %v3329_v1 }
 0x14c   : > { %2991 = vmatpush3.bf16.msra.mxu0 %v3237_v35 }
 0x14d   : > { %2992 = vmatprep.subr.bf16.mxu0 %v3329_v1 }
 0x14e   : > { %2973 = vmatpush3.bf16.msra.mxu1 %v3227_v23  ;;  %v3263_v23 = vld [vmem:[%s4025_s7 + $0x18] sm:$0xff]  }
 0x14f   : > { %2974 = vmatprep.subr.bf16.mxu1 %v3329_v1 }
 0x150   : > { %2993 = vmatpush3.bf16.msra.mxu0 %v3239_v37 }
 0x151   : > { %2994 = vmatprep.subr.bf16.mxu0 %v3329_v1 }
 0x152   : > { %2975 = vmatpush3.bf16.msra.mxu1 %v3228_v24  ;;  %v3264_v24 = vld [vmem:[%s4025_s7 + $0x58] sm:$0xff]  }
 0x153   : > { %2976 = vmatprep.subr.bf16.mxu1 %v3329_v1 }
 0x154   : > { %2995 = vmatpush3.bf16.msra.mxu0 %v3241_v39 }
 0x155   : > { %2996 = vmatprep.subr.bf16.mxu0 %v3329_v1 }
 0x156   : > { %2977 = vmatpush3.bf16.msra.mxu1 %v3229_v25  ;;  %v3265_v25 = vld [vmem:[%s4025_s7 + $0x10] sm:$0xff]  }
 0x157   : > { %2978 = vmatprep.subr.bf16.mxu1 %v3329_v1 }
 0x158   : > { %2997 = vmatpush3.bf16.msra.mxu0 %v3243_v41 }
 0x159   : > { %2998 = vmatprep.subr.bf16.mxu0 %v3329_v1 }
 0x15a   : > { %2979 = vmatpush3.bf16.msra.mxu1 %v3230_v26  ;;  %v3266_v26 = vld [vmem:[%s4025_s7 + $0x50] sm:$0xff]  }
 0x15b   : > { %3004 = vmatprep.subr.bf16.mxu1 %v3329_v1 }
 0x15c   : > { %2999 = vmatpush3.bf16.msra.mxu0 %v3245_v43 }
 0x15d   : > { %2981 = vmatmul.mubr.bf16.vlgmr.msra.gmra.mxu1 %v1233_v28  ;;  %3024 = vmatprep.subr.bf16.mxu0 %v3329_v1  ;;  %v3268_v28 = vld [vmem:[%s4025_s7 + $0x48] sm:$0xff]  }
 0x15e   : > { %3020 = vmatprep.mubr.msk.bf16.mxu1 %vm3330_vm0, %v3329_v1  ;;  %3005 = vmatpush3.bf16.msra.mxu1 %v3232_v30  ;;  %v3270_v30 = vld [vmem:[%s4025_s7 + $0x40] sm:$0xff]  }
 0x15f   : > { %3006 = vmatprep.subr.bf16.mxu1 %v3329_v1 }
 0x162   : > { %3007 = vmatpush3.bf16.msra.mxu1 %v3234_v32 }
 0x163   : > { %3008 = vmatprep.subr.bf16.mxu1 %v3329_v1 }
 0x166   : > { %3009 = vmatpush3.bf16.msra.mxu1 %v3236_v34 }
 0x167   : > { %3010 = vmatprep.subr.bf16.mxu1 %v3329_v1 }
 0x16a   : > { %3011 = vmatpush3.bf16.msra.mxu1 %v3238_v36 }
 0x16b   : > { %3012 = vmatprep.subr.bf16.mxu1 %v3329_v1 }
 0x16e   : > { %3013 = vmatpush3.bf16.msra.mxu1 %v3240_v38 }
 0x16f   : > { %3014 = vmatprep.subr.bf16.mxu1 %v3329_v1 }
 0x172   : > { %3015 = vmatpush3.bf16.msra.mxu1 %v3242_v40 }
 0x173   : > { %3016 = vmatprep.subr.bf16.mxu1 %v3329_v1 }
 0x176   : > { %3017 = vmatpush3.bf16.msra.mxu1 %v3244_v42  ;;  %v2634_v42 = vld [vmem:[%s4024_s6] ss:$0 sm:$0xff] }
 0x177   : > { %3018 = vmatprep.subr.bf16.mxu1 %v3329_v1 }
 0x17a   : > { %3019 = vmatpush3.bf16.msra.mxu1 %v3246_v44 }
 0x17b   : > { %3044 = vmatprep.subr.bf16.mxu1 %v3329_v1 }
 0x1fd   : > { %v1137_v45 = vpop.f32.mrf.mxu1  ;;  %v1225_v46 = vpop.f32.mrf.mxu0 }
 0x1fe   : > { %v1226_v53 = vadd.f32 %v1225_v46, %v1137_v45 }
 0x1ff   : > { %v2942_v47 = vpop.f32.mrf.mxu1  ;;  %v2962_v48 = vpop.f32.mrf.mxu0 }
 0x201   : > { %v1140_v49 = vpop.f32.mrf.mxu1  ;;  %v1228_v50 = vpop.f32.mrf.mxu0 }
 0x202   : > { %v3271_v49 = vld [vmem:[%s4025_s7 + $0xb8] sm:$0xff]  }
 0x203   : > { %v2943_v51 = vpop.f32.mrf.mxu1  ;;  %v2963_v52 = vpop.f32.mrf.mxu0 }
 0x204   : > { %v3272_v51 = vld [vmem:[%s4025_s7 + $0xf8] sm:$0xff]  }
 0x21d   : > { %v1333_v54 = vpop.f32.mrf.mxu1 }
 0x21e   : > { %v1339_v56 = vadd.f32 %v1333_v54, %v1226_v53  ;;  %v3273_v53 = vld [vmem:[%s4025_s7 + $0xb0] sm:$0xff]  }
 0x21f   : > { %v2982_v57 = vpop.f32.mrf.mxu1  ;;  %v3274_v54 = vld [vmem:[%s4025_s7 + $0xf0] sm:$0xff]  }
 0x220   : > { %v1347_v58 = vadd.f32 %v2577_v55, %v1339_v56  ;;  %v3275_v55 = vld [vmem:[%s4025_s7 + $0xa8] sm:$0xff]   ;;  %v3277_v57 = vld [vmem:[%s4025_s7 + $0xa0] sm:$0xff]  }
 0x221   : > { %v1336_v59 = vpop.f32.mrf.mxu1  ;;  %v3276_v56 = vld [vmem:[%s4025_s7 + $0xe8] sm:$0xff]  }
 0x222   : > { %v1348_v60 = vmax.f32 %v1347_v58, 0.0  ;;  %v3278_v58 = vld [vmem:[%s4025_s7 + $0xe0] sm:$0xff]   ;;  %v3279_v59 = vld [vmem:[%s4025_s7 + $0x98] sm:$0xff]  }
 0x223   : > { %v2983_v61 = vpop.f32.mrf.mxu1 }
 0x224   : > { %v1350_v62 = vrot.slane %v1348_v60, 7  ;;  %v3280_v60 = vld [vmem:[%s4025_s7 + $0xd8] sm:$0xff]   ;;  %v3281_v61 = vld [vmem:[%s4025_s7 + $0x90] sm:$0xff]  }
 0x226   : > { %v1352_v63 = vsel %vm1006_vm3, 0.0, %v1350_v62  ;;  %1354 = vst [vmem:[#allocation3 + $0x8] sm:$0x1] %v1350_v62  ;;  %v3282_v62 = vld [vmem:[%s4025_s7 + $0xd0] sm:$0xff]  }
 0x227   : > { %1353 = vst [vmem:[#allocation3] sm:$0xff] %v1352_v63  ;;  %v3283_v63 = vld [vmem:[%s4025_s7 + $0x88] sm:$0xff]  }
 0x22e   : > { %v1374_v2 = vld [vmem:[#allocation3 + $0x1] ss:$2 sm:$0xf]  ;;  %v1355_v3 = vld [vmem:[#allocation3] ss:$2 sm:$0xf] }
 0x22f   : > { %v1375_v4 = vpack.c.bf16 %v1374_v2, %v1374_v2  ;;  %v1356_v5 = vpack.c.bf16 %v1355_v3, %v1355_v3  ;;  %v1570_v13 = vld [vmem:[#allocation3 + $0x2] ss:$2 sm:$0xf] }
 0x230   : > { %v1571_v14 = vpack.c.bf16 %v1570_v13, %v1570_v13  ;;  %v3285_v2 = vld [vmem:[%s4025_s7 + $0x80] sm:$0xff]   ;;  %v3292_v13 = vld [vmem:[%s4027_s9 + $0x10] sm:$0xff]  }
 0x231   : > { %3001 = vmatmul.mubr.bf16.vlgmr.msra.gmra.mxu0 %v1375_v4  ;;  %3021 = vmatmul.mubr.bf16.vlgmr.msra.gmra.mxu1 %v1356_v5  ;;  %v3286_v3 = vld [vmem:[%s4025_s7 + $0xc0] sm:$0xff]  }
 0x232   : > { %3025 = vmatpush3.bf16.msra.mxu0 %v3247_v0  ;;  %3040 = vmatprep.mubr.msk.bf16.mxu0 %vm3330_vm0, %v3329_v1  ;;  %v3284_v0 = vld [vmem:[%s4025_s7 + $0xc8] sm:$0xff]  }
 0x233   : > { %3026 = vmatprep.subr.bf16.mxu0 %v3329_v1  ;;  %3060 = vmatprep.mubr.msk.bf16.mxu1 %vm3330_vm0, %v3329_v1 }
 0x234   : > { %3045 = vmatpush3.bf16.msra.mxu1 %v3255_v15 }
 0x235   : > { %3046 = vmatprep.subr.bf16.mxu1 %v3329_v1 }
 0x236   : > { %3027 = vmatpush3.bf16.msra.mxu0 %v3248_v6  ;;  %v3287_v6 = vld [vmem:[%s4027_s9 + $0x38] sm:$0xff]  }
 0x237   : > { %3028 = vmatprep.subr.bf16.mxu0 %v3329_v1 }
 0x238   : > { %3047 = vmatpush3.bf16.msra.mxu1 %v3257_v17 }
 0x239   : > { %3048 = vmatprep.subr.bf16.mxu1 %v3329_v1 }
 0x23a   : > { %3029 = vmatpush3.bf16.msra.mxu0 %v3249_v7  ;;  %v2716_v7 = vld [vmem:[%s635_s19] ss:$0 sm:$0xff]  ;;  %s641_s19 = scalar_lea.vmem %s4036_s18, %s3482_s1 }
 0x23b   : > { %3030 = vmatprep.subr.bf16.mxu0 %v3329_v1  ;;  %2152 = vrot.lane.b32.xlu1 %v2716_v7, %s3331_s23  ;;  %s632_s23 = scalar_lea.vmem %s4032_s14, %s3482_s1 }
 0x23c   : > { %3049 = vmatpush3.bf16.msra.mxu1 %v3259_v19 }
 0x23d   : > { %3050 = vmatprep.subr.bf16.mxu1 %v3329_v1 }
 0x23e   : > { %3031 = vmatpush3.bf16.msra.mxu0 %v3250_v8  ;;  %v3288_v8 = vld [vmem:[%s4027_s9 + $0x30] sm:$0xff]  }
 0x23f   : > { %3032 = vmatprep.subr.bf16.mxu0 %v3329_v1 }
 0x240   : > { %3051 = vmatpush3.bf16.msra.mxu1 %v3261_v21 }
 0x241   : > { %3052 = vmatprep.subr.bf16.mxu1 %v3329_v1 }
 0x242   : > { %3033 = vmatpush3.bf16.msra.mxu0 %v3251_v9  ;;  %v2717_v9 = vld [vmem:[%s638_s22] ss:$0 sm:$0xff] }
 0x243   : > { %3034 = vmatprep.subr.bf16.mxu0 %v3329_v1  ;;  %2160 = vrot.lane.b32.xlu1 %v2717_v9, %s3332_s30  ;;  %s2124_s30 = sld [smem:[#allocation4 + %s2123_s29]] }
 0x244   : > { %3053 = vmatpush3.bf16.msra.mxu1 %v3263_v23 }
 0x245   : > { %3054 = vmatprep.subr.bf16.mxu1 %v3329_v1 }
 0x246   : > { %3035 = vmatpush3.bf16.msra.mxu0 %v3252_v10  ;;  %v3289_v10 = vld [vmem:[%s4027_s9 + $0x28] sm:$0xff]  }
 0x247   : > { %3036 = vmatprep.subr.bf16.mxu0 %v3329_v1 }
 0x248   : > { %3055 = vmatpush3.bf16.msra.mxu1 %v3265_v25 }
 0x249   : > { %3056 = vmatprep.subr.bf16.mxu1 %v3329_v1 }
 0x24a   : > { %3037 = vmatpush3.bf16.msra.mxu0 %v3253_v11  ;;  %v3290_v11 = vld [vmem:[%s4027_s9 + $0x20] sm:$0xff]  }
 0x24b   : > { %3038 = vmatprep.subr.bf16.mxu0 %v3329_v1 }
 0x24c   : > { %3057 = vmatpush3.bf16.msra.mxu1 %v3267_v27 }
 0x24d   : > { %3058 = vmatprep.subr.bf16.mxu1 %v3329_v1 }
 0x24e   : > { %3039 = vmatpush3.bf16.msra.mxu0 %v3254_v12  ;;  %v3291_v12 = vld [vmem:[%s4027_s9 + $0x18] sm:$0xff]  }
 0x24f   : > { %3064 = vmatprep.subr.bf16.mxu0 %v3329_v1 }
 0x250   : > { %3059 = vmatpush3.bf16.msra.mxu1 %v3269_v29 }
 0x251   : > { %3041 = vmatmul.mubr.bf16.vlgmr.msra.gmra.mxu0 %v1571_v14  ;;  %3084 = vmatprep.subr.bf16.mxu1 %v3329_v1 }
 0x252   : > { %3080 = vmatprep.mubr.msk.bf16.mxu0 %vm3330_vm0, %v3329_v1  ;;  %3065 = vmatpush3.bf16.msra.mxu0 %v3256_v16 }
 0x253   : > { %3066 = vmatprep.subr.bf16.mxu0 %v3329_v1 }
 0x256   : > { %3067 = vmatpush3.bf16.msra.mxu0 %v3258_v18 }
 0x257   : > { %3068 = vmatprep.subr.bf16.mxu0 %v3329_v1 }
 0x25a   : > { %3069 = vmatpush3.bf16.msra.mxu0 %v3260_v20 }
 0x25b   : > { %3070 = vmatprep.subr.bf16.mxu0 %v3329_v1 }
 0x25e   : > { %3071 = vmatpush3.bf16.msra.mxu0 %v3262_v22  ;;  %v1687_v22 = vld [vmem:[%s4026_s8] sm:$0x1] }
 0x25f   : > { %3072 = vmatprep.subr.bf16.mxu0 %v3329_v1 }
 0x262   : > { %3073 = vmatpush3.bf16.msra.mxu0 %v3264_v24 }
 0x263   : > { %3074 = vmatprep.subr.bf16.mxu0 %v3329_v1 }
 0x266   : > { %3075 = vmatpush3.bf16.msra.mxu0 %v3266_v26 }
 0x267   : > { %3076 = vmatprep.subr.bf16.mxu0 %v3329_v1 }
 0x26a   : > { %3077 = vmatpush3.bf16.msra.mxu0 %v3268_v28 }
 0x26b   : > { %3078 = vmatprep.subr.bf16.mxu0 %v3329_v1 }
 0x26e   : > { %3079 = vmatpush3.bf16.msra.mxu0 %v3270_v30 }
 0x26f   : > { %3104 = vmatprep.subr.bf16.mxu0 %v3329_v1 }
 0x2f1   : > { %v1475_v32 = vpop.f32.mrf.mxu0  ;;  %v1563_v33 = vpop.f32.mrf.mxu1 }
 0x2f2   : > { %v1564_v40 = vadd.f32 %v1563_v33, %v1475_v32 }
 0x2f3   : > { %v3002_v34 = vpop.f32.mrf.mxu0  ;;  %v3022_v35 = vpop.f32.mrf.mxu1 }
 0x2f5   : > { %v1478_v36 = vpop.f32.mrf.mxu0  ;;  %v1566_v37 = vpop.f32.mrf.mxu1 }
 0x2f6   : > { %v3293_v37 = vld [vmem:[%s4027_s9 + $0x8] sm:$0xff]  }
 0x2f7   : > { %v3003_v38 = vpop.f32.mrf.mxu0  ;;  %v3023_v39 = vpop.f32.mrf.mxu1 }
 0x2f8   : > { %v3294_v38 = vld [vmem:[%s4027_s9] sm:$0xff]   ;;  %v2132_v39 = vpop.permute.xlu0 %2131 }
 0x311   : > { %v1671_v41 = vpop.f32.mrf.mxu0 }
 0x312   : > { %v1677_v43 = vadd.f32 %v1671_v41, %v1564_v40  ;;  %v3295_v41 = vld [vmem:[%s4029_s11 + $0x18] sm:$0xff]  }
 0x313   : > { %v3042_v44 = vpop.f32.mrf.mxu0 }
 0x314   : > { %v1685_v45 = vadd.f32 %v2634_v42, %v1677_v43  ;;  %v3296_v43 = vld [vmem:[%s4029_s11 + $0x10] sm:$0xff]   ;;  %v2125_v44 = vld [vmem:[%s632_s23] sm:$0x1] }
 0x315   : > { %v1674_v46 = vpop.f32.mrf.mxu0 }
 0x316   : > { %v1686_v47 = vmax.f32 %v1685_v45, 0.0  ;;  %v2142_v45 = vstv %s2124_s30  ;;  %v2153_v46 = vpop.permute.xlu1 %2152 }
 0x317   : > { %v3043_v48 = vpop.f32.mrf.mxu0 }
 0x318   : > { %v1688_v50 = vpack.c.bf16 %v1686_v47, %v1686_v47  ;;  %v2140_v47 = vstv %s2122_s0 }
 0x31a   : > { %3061 = vmatmul.mubr.bf16.vlgmr.msra.gmra.mxu1 %v1688_v50  ;;  %v1812_v52 = vshrl.u32 %v1688_v50, 16  ;;  %v1922_v4 = vrot.slane %v1688_v50, 1 }
 0x31b   : > { %3085 = vmatpush3.bf16.msra.mxu1 %v3271_v49  ;;  %3100 = vmatprep.mubr.msk.bf16.mxu1 %vm3330_vm0, %v3329_v1  ;;  %v2143_v49 = vmul.f32 %v2142_v45, %v2125_v44 }
 0x31c   : > { %3081 = vmatmul.mubr.bf16.vlgmr.msra.gmra.mxu0 %v1812_v52  ;;  %3086 = vmatprep.subr.bf16.mxu1 %v3329_v1  ;;  %v2030_v5 = vrot.slane %v1812_v52, 1 }
 0x31d   : > { %3105 = vmatpush3.bf16.msra.mxu0 %v3272_v51  ;;  %3120 = vmatprep.mubr.msk.bf16.mxu0 %vm3330_vm0, %v3329_v1 }
 0x31e   : > { %3106 = vmatprep.subr.bf16.mxu0 %v3329_v1 }
 0x31f   : > { %3087 = vmatpush3.bf16.msra.mxu1 %v3273_v53  ;;  %v2161_v53 = vpop.permute.xlu1 %2160 }
 0x320   : > { %3088 = vmatprep.subr.bf16.mxu1 %v3329_v1 }
 0x321   : > { %3107 = vmatpush3.bf16.msra.mxu0 %v3274_v54 }
 0x322   : > { %3108 = vmatprep.subr.bf16.mxu0 %v3329_v1 }
 0x323   : > { %3089 = vmatpush3.bf16.msra.mxu1 %v3275_v55 }
 0x324   : > { %3090 = vmatprep.subr.bf16.mxu1 %v3329_v1 }
 0x325   : > { %3109 = vmatpush3.bf16.msra.mxu0 %v3276_v56 }
 0x326   : > { %3110 = vmatprep.subr.bf16.mxu0 %v3329_v1 }
 0x327   : > { %3091 = vmatpush3.bf16.msra.mxu1 %v3277_v57  ;;  %v3297_v57 = vld [vmem:[%s4029_s11 + $0x8] sm:$0xff]  }
 0x328   : > { %3092 = vmatprep.subr.bf16.mxu1 %v3329_v1 }
 0x329   : > { %3111 = vmatpush3.bf16.msra.mxu0 %v3278_v58  ;;  %v3298_v58 = vld [vmem:[%s4029_s11] sm:$0xff]  }
 0x32a   : > { %3112 = vmatprep.subr.bf16.mxu0 %v3329_v1 }
 0x32b   : > { %3093 = vmatpush3.bf16.msra.mxu1 %v3279_v59  ;;  %v2184_v59 = vld [vmem:[%s4028_s10] sm:$0x1] }
 0x32c   : > { %3094 = vmatprep.subr.bf16.mxu1 %v3329_v1 }
 0x32d   : > { %3113 = vmatpush3.bf16.msra.mxu0 %v3280_v60 }
 0x32e   : > { %3114 = vmatprep.subr.bf16.mxu0 %v3329_v1 }
 0x32f   : > { %3095 = vmatpush3.bf16.msra.mxu1 %v3281_v61 }
 0x330   : > { %3096 = vmatprep.subr.bf16.mxu1 %v3329_v1 }
 0x331   : > { %3115 = vmatpush3.bf16.msra.mxu0 %v3282_v62 }
 0x332   : > { %3116 = vmatprep.subr.bf16.mxu0 %v3329_v1 }
 0x333   : > { %3097 = vmatpush3.bf16.msra.mxu1 %v3283_v63 }
 0x334   : > { %3098 = vmatprep.subr.bf16.mxu1 %v3329_v1 }
 0x335   : > { %3117 = vmatpush3.bf16.msra.mxu0 %v3284_v0 }
 0x336   : > { %3118 = vmatprep.subr.bf16.mxu0 %v3329_v1 }
 0x337   : > { %3099 = vmatpush3.bf16.msra.mxu1 %v3285_v2 }
 0x338   : > { %3124 = vmatprep.subr.bf16.mxu1 %v3329_v1 }
 0x339   : > { %3119 = vmatpush3.bf16.msra.mxu0 %v3286_v3 }
 0x33a   : > { %3101 = vmatmul.mubr.bf16.vlgmr.msra.gmra.mxu1 %v1922_v4  ;;  %3144 = vmatprep.subr.bf16.mxu0 %v3329_v1 }
 0x33b   : > { %3140 = vmatprep.mubr.msk.bf16.mxu1 %vm3330_vm0, %v3329_v1  ;;  %3125 = vmatpush3.bf16.msra.mxu1 %v3287_v6 }
 0x33c   : > { %3121 = vmatmul.mubr.bf16.vlgmr.msra.gmra.mxu0 %v2030_v5  ;;  %3126 = vmatprep.subr.bf16.mxu1 %v3329_v1 }
 0x33d   : > { %3152 = vmatprep.mubr.msk.bf16.mxu0 %vm3330_vm0, %v3329_v1  ;;  %3145 = vmatpush3.bf16.msra.mxu0 %v3295_v41 }
 0x33e   : > { %3146 = vmatprep.subr.bf16.mxu0 %v3329_v1 }
 0x33f   : > { %3127 = vmatpush3.bf16.msra.mxu1 %v3288_v8 }
 0x340   : > { %3128 = vmatprep.subr.bf16.mxu1 %v3329_v1 }
 0x341   : > { %3147 = vmatpush3.bf16.msra.mxu0 %v3296_v43 }
 0x342   : > { %3148 = vmatprep.subr.bf16.mxu0 %v3329_v1 }
 0x343   : > { %3129 = vmatpush3.bf16.msra.mxu1 %v3289_v10 }
 0x344   : > { %3130 = vmatprep.subr.bf16.mxu1 %v3329_v1 }
 0x345   : > { %3149 = vmatpush3.bf16.msra.mxu0 %v3297_v57 }
 0x346   : > { %3150 = vmatprep.subr.bf16.mxu0 %v3329_v1 }
 0x347   : > { %3131 = vmatpush3.bf16.msra.mxu1 %v3290_v11 }
 0x348   : > { %3132 = vmatprep.subr.bf16.mxu1 %v3329_v1 }
 0x349   : > { %3151 = vmatpush3.bf16.msra.mxu0 %v3298_v58 }
 0x34b   : > { %3133 = vmatpush3.bf16.msra.mxu1 %v3291_v12 }
 0x34c   : > { %3134 = vmatprep.subr.bf16.mxu1 %v3329_v1 }
 0x34f   : > { %3135 = vmatpush3.bf16.msra.mxu1 %v3292_v13 }
 0x350   : > { %3136 = vmatprep.subr.bf16.mxu1 %v3329_v1 }
 0x353   : > { %3137 = vmatpush3.bf16.msra.mxu1 %v3293_v37 }
 0x354   : > { %3138 = vmatprep.subr.bf16.mxu1 %v3329_v1  ;;  %v2283_v1 = vld [vmem:[%s4030_s12] sm:$0x1] }
 0x357   : > { %3139 = vmatpush3.bf16.msra.mxu1 %v3294_v38 }
 0x3da   : > { %v1787_v14 = vpop.f32.mrf.mxu1 }
 0x3db   : > { %v1793_v23 = vadd.f32 %v1787_v14, %v1687_v22 }
 0x3dc   : > { %v3062_v15 = vpop.f32.mrf.mxu1  ;;  %v1897_v16 = vpop.f32.mrf.mxu0 }
 0x3dd   : > { %v1903_v24 = vadd.f32 %v1897_v16, %v1793_v23 }
 0x3de   : > { %v1790_v17 = vpop.f32.mrf.mxu1  ;;  %v3082_v18 = vpop.f32.mrf.mxu0 }
 0x3e0   : > { %v3063_v19 = vpop.f32.mrf.mxu1  ;;  %v1900_v20 = vpop.f32.mrf.mxu0 }
 0x3e2   : > { %v3083_v21 = vpop.f32.mrf.mxu0 }
 0x3fa   : > { %v2006_v25 = vpop.f32.mrf.mxu1 }
 0x3fb   : > { %v2012_v26 = vadd.f32 %v2006_v25, %v1903_v24 }
 0x3fc   : > { %v3102_v27 = vpop.f32.mrf.mxu1  ;;  %v2114_v28 = vpop.f32.mrf.mxu0 }
 0x3fd   : > { %v2120_v29 = vadd.f32 %v2114_v28, %v2012_v26 }
 0x3fe   : > { %v2009_v30 = vpop.f32.mrf.mxu1  ;;  %v3122_v31 = vpop.f32.mrf.mxu0 }
 0x3ff   : > { %v2126_v32 = vmul.f32 0.5, %v2120_v29 }
 0x400   : > { %v3103_v33 = vpop.f32.mrf.mxu1  ;;  %v2117_v34 = vpop.f32.mrf.mxu0 }
 0x401   : > { %v2127_v35 = vmul.f32 1.442695, %v2126_v32 }
 0x402   : > { %v3123_v36 = vpop.f32.mrf.mxu0 }
 0x403   : > { %3299 = vpow2.f32 %v2127_v35 }
 0x410   : > { %v3300_v40 = vpop.eup %3299 }
 0x411   : > { %v2134_v42 = vmul.f32 %v3300_v40, %v2132_v39 }
 0x413   : > { %2136 = vrot.lane.b32.xlu0 %v2134_v42, %s3333_s26 }
 0x485   : > { %v2137_v48 = vpop.permute.xlu0 %2136 }
 0x486   : > { %v2139_v50 = vadd.f32 %v2137_v48, %v2120_v29 }
 0x488   : > { %v2141_v51 = vmul.f32 %v2140_v47, %v2139_v50 }
 0x48a   : > { %v2144_v52 = vadd.f32 %v2143_v49, %v2141_v51 }
 0x48c   : > { %v2164_v54 = vsel %vm2163_vm4, %v2144_v52, %v2153_v46 }
 0x48d   : > { %v2166_v55 = vsel %vm2165_vm5, %v2164_v54, %v2161_v53 }
 0x48e   : > { %v2167_v56 = vpack.c.bf16 %v2166_v55, %v2166_v55 }
 0x490   : > { %3141 = vmatmul.mubr.bf16.vlgmr.msra.gmra.mxu1 %v2167_v56 }
 0x550   : > { %v2267_v60 = vpop.f32.mrf.mxu1 }
 0x551   : > { %v2268_v61 = vadd.f32 %v2267_v60, %v2184_v59 }
 0x552   : > { %v3142_v62 = vpop.f32.mrf.mxu1 }
 0x553   : > { %v2273_v63 = vmax.f32 %v2268_v61, 0.0 }
 0x554   : > { %v2270_v0 = vpop.f32.mrf.mxu1 }
 0x555   : > { %v2274_v2 = vpack.c.bf16 %v2273_v63, %v2273_v63 }
 0x556   : > { %v3143_v3 = vpop.f32.mrf.mxu1 }
 0x557   : > { %3153 = vmatmul.mubr.msk.bf16.vlgmr.msra.gmra.mxu0 %vm2165_vm5, %v2274_v2 }
 0x617   : > { %v2345_v4 = vpop.f32.mrf.mxu0 }
 0x618   : > { %v2346_v5 = vadd.f32 %v2345_v4, %v2283_v1 }
 0x619   : > { %v3154_v6 = vpop.f32.mrf.mxu0 }
 0x61a   : > { %v2351_v7 = vsub.f32 %v2346_v5, %v2125_v44 }
 0x61b   : > { %v2348_v8 = vpop.f32.mrf.mxu0 }
 0x61c   : > { %v2352_v9 = vmul.f32 %v2351_v7, %v2351_v7 }
 0x61d   : > { %v3155_v10 = vpop.f32.mrf.mxu0 }
 0x61e   : > { %v2354_v11 = vsel %vm2353_vm6, %v2352_v9, 0.0 }
 0x61f   : > { %2355 = vadd.xlane.f32.xlu0 %v2354_v11 }
 0x6a8   : > { %v2356_v12 = vpop.xlane.xlu0 %2355 }
 0x6a9   : > { %2358 = vst.msk [vmem:[%s641_s19] sm:$0x1] %vm2357_vm7, %v2356_v12 }
 0x6aa PF: > { %s29_s27 = sadd.s32 1, %s3326_s27  }
 0x6ab   : > { %p26_p1 = scmp.ge.s32.totalorder %s29_s27, 4  }
 0x6ad   :  { %28 = sbr.rel (!%p26_p1) target bundleno = 5 (0x5), region = 152 }
 0x6b2   :  { %2376 = vsyncpa [#allocation5], 1 }
 0x6b3   :  { %2378 = vsyncpa [#allocation5 + $0x1], 1 }

</bundles_post_ra>
